<compile_context>
chip_gen: v7x
topology: tpu7x:2x2x1
jax: 0.10.0
libtpu: 0.0.40
codegen_flags: <defaults>
</compile_context>

<pallas_src>
import functools

import jax
import jax.numpy as jnp
from jax import lax
from jax.experimental import pallas as pl
from jax.experimental.pallas import tpu as pltpu
from jax.scipy.special import gammaln, digamma

# ---- fixed architecture constants from the PyTorch module -------------------
SECOND_HIDDEN = 500
THIRD = SECOND_HIDDEN - 100          # 400
FRAMES = 3
BN_EPS = 1e-5
LEAKY_SLOPE = 0.01

# ---- lane-padded layout constants --------------------------------------------
LANE = 128
SH_PAD = 512                         # 500 -> 512 (lane-dense)
THIRD_PAD = 512                      # 400 -> 512 (lane-dense)
HEADS_W = 128                        # fused head output width (lane-dense store)
N_SMALL = 8                          # rows of the packed small-param array

# VMEM budget for the single-invocation kernel (fits v7x's 64 MiB physical VMEM
# with headroom; raised above v5e's 16 MiB default scoped limit explicitly).
VMEM_CAP_BYTES = 48 << 20


def _round_up(n, m):
    return ((n + m - 1) // m) * m


# -----------------------------------------------------------------------------
# Pallas kernel: the whole MLP hot path in one VMEM-resident block.
# -----------------------------------------------------------------------------
def _ppo_kernel(
    x_ref,       # (B, input_size)          f32
    w_in_ref,    # (input_size, Hp)         bf16
    w_h_ref,     # (Hp, 512)                bf16
    w_pb_ref,    # (512, 512)               bf16
    w_ab_ref,    # (512, 512)               bf16   actor_body  (lane-padded)
    w_cb_ref,    # (512, 512)               bf16   critic_body (lane-padded)
    w_ha_ref,    # (512, 128)               bf16   fused actor heads (mean|alpha|beta)
    w_hc_ref,    # (512, 128)               bf16   critic head (value at col A+4)
    small_ref,   # (8, >=512)               f32    packed biases / BN affine
    heads_ref,   # (B, 128)                 f32    lane-dense fused head output
    *, action_size,
):
    Hp = w_in_ref.shape[1]
    A = action_size

    def mm(h, w_ref):
        # bf16 x bf16 MXU matmul with f32 accumulation.
        return jnp.dot(h.astype(jnp.bfloat16), w_ref[...],
                       preferred_element_type=jnp.float32)

    def leaky_relu(h):
        # max(h, s*h) == leaky_relu(h) for 0 < s < 1 (one VALU op, no select).
        return jnp.maximum(h, LEAKY_SLOPE * h)

    def softplus(h):
        # numerically stable log(1 + exp(h))
        return jnp.maximum(h, 0.0) + jnp.log(1.0 + jnp.exp(-jnp.abs(h)))

    def batch_norm(h, gamma, beta):
        # training-mode BatchNorm1d: batch mean / biased batch var.  gamma is folded
        # into the rsqrt scale so the per-element multiply happens once on (1, N).
        mu = jnp.mean(h, axis=0, keepdims=True)
        d = h - mu
        var = jnp.mean(d * d, axis=0, keepdims=True)
        scale = gamma * lax.rsqrt(var + BN_EPS)          # (1, N), EUP rsqrt
        return d * scale + beta

    # ---- packed small params (all f32, static lane-aligned slices of one ref) ----
    g_bni = small_ref[0:1, 0:Hp]
    b_bni = small_ref[1:2, 0:Hp]
    g_bn  = small_ref[2:3, 0:SH_PAD]
    b_bn  = small_ref[3:4, 0:SH_PAD]
    b_pb  = small_ref[4:5, 0:THIRD_PAD]
    b_ab  = small_ref[5:6, 0:THIRD_PAD]
    b_cb  = small_ref[6:7, 0:THIRD_PAD]
    b_hd  = small_ref[7:8, 0:HEADS_W]

    x = x_ref[...]

    # Linear bias immediately before training-mode BN cancels exactly -> b_in / b_h
    # are dropped from the computation (mathematically identical output).
    h = leaky_relu(batch_norm(mm(x, w_in_ref), g_bni, b_bni))
    h = leaky_relu(batch_norm(mm(h, w_h_ref), g_bn, b_bn))
    h = leaky_relu(mm(h, w_pb_ref) + b_pb)

    # actor / critic bodies: static lane-dense halves, tanh only on the actor branch.
    act_x    = jnp.tanh(mm(h, w_ab_ref) + b_ab)
    critic_x = leaky_relu(mm(h, w_cb_ref) + b_cb)

    # fused heads: two half-K matmuls into one (B, 128) lane-dense block.
    #   [0, A)        -> tanh          (mean)
    #   [A, A+4)      -> softplus + 1  (alpha, beta)
    #   [A+4, A+5)    -> identity      (value); remaining lanes are zero padding.
    heads = mm(act_x, w_ha_ref) + mm(critic_x, w_hc_ref) + b_hd
    col = lax.broadcasted_iota(jnp.int32, heads.shape, 1)
    heads = jnp.where(col < A, jnp.tanh(heads),
                      jnp.where(col < A + 4, softplus(heads) + 1.0, heads))
    heads_ref[...] = heads


def _run_ppo_kernel(x, packed, action_size):
    """Single-invocation pallas_call; weights (~1.1 MiB bf16) + the whole batch of
    activations are VMEM-resident, amortizing the weight DMA across all rows.
    The batch is bounded so the block respects v7x's 64 MiB physical VMEM."""
    batch, input_size = x.shape
    Hp = packed["w_in"].shape[1]

    weight_names = ("w_in", "w_h", "w_pb", "w_ab", "w_cb", "w_ha", "w_hc", "small")
    weight_bytes = sum(int(packed[k].size) * packed[k].dtype.itemsize
                       for k in weight_names)
    # conservative per-row activation footprint (f32 intermediates + bf16 temps)
    per_row_bytes = 8 * (input_size + Hp + SH_PAD + 3 * THIRD_PAD + HEADS_W)
    assert weight_bytes + batch * per_row_bytes <= VMEM_CAP_BYTES, (
        f"batch {batch} too large for the single-invocation kernel; "
        "tile the batch (requires a two-pass BatchNorm, see TODO).")

    vmem = pl.BlockSpec(memory_space=pltpu.MemorySpace.VMEM)
    kernel = functools.partial(_ppo_kernel, action_size=action_size)
    return pl.pallas_call(
        kernel,
        out_shape=jax.ShapeDtypeStruct((batch, HEADS_W), jnp.float32),
        in_specs=[vmem] * 9,
        out_specs=vmem,
        compiler_params=pltpu.CompilerParams(vmem_limit_bytes=VMEM_CAP_BYTES),
    )(x, packed["w_in"], packed["w_h"], packed["w_pb"],
      packed["w_ab"], packed["w_cb"], packed["w_ha"], packed["w_hc"],
      packed["small"])


# -----------------------------------------------------------------------------
# Parameter packing: lane-pad ragged dims, fuse head weights, cast matmul weights
# to bf16 once, pack all tiny vectors into a single f32 array.
# -----------------------------------------------------------------------------
def pack_params(params, hidden_size, action_size):
    H, A = hidden_size, action_size
    Hp = _round_up(H, LANE)
    f32 = jnp.float32

    def pad2(w, rows, cols):
        out = jnp.zeros((rows, cols), f32)
        return out.at[:w.shape[0], :w.shape[1]].set(w)

    w_in = pad2(params["w_in"], params["w_in"].shape[0], Hp)   # (input_size, Hp)
    w_h  = pad2(params["w_h"],  Hp, SH_PAD)                    # (Hp, 512)
    w_pb = pad2(params["w_pb"], SH_PAD, THIRD_PAD)             # (512, 512)
    w_ab = pad2(params["w_ab"], THIRD_PAD, THIRD_PAD)          # (512, 512)
    w_cb = pad2(params["w_cb"], THIRD_PAD, THIRD_PAD)          # (512, 512)

    # fused actor heads (mean | alpha | beta) and critic head (value at col A+4)
    w_ha = jnp.zeros((THIRD_PAD, HEADS_W), f32)
    w_ha = w_ha.at[0:THIRD, 0:A].set(params["w_ah"])
    w_ha = w_ha.at[0:THIRD, A:A + 2].set(params["w_alpha"])
    w_ha = w_ha.at[0:THIRD, A + 2:A + 4].set(params["w_beta"])
    w_hc = jnp.zeros((THIRD_PAD, HEADS_W), f32)
    w_hc = w_hc.at[0:THIRD, A + 4:A + 5].set(params["w_ch"])

    small_w = max(Hp, SH_PAD, THIRD_PAD, HEADS_W)
    small = jnp.zeros((N_SMALL, small_w), f32)
    small = small.at[0, 0:H].set(params["bn_in_gamma"].reshape(-1))
    small = small.at[1, 0:H].set(params["bn_in_beta"].reshape(-1))
    small = small.at[2, 0:SECOND_HIDDEN].set(params["bn_gamma"].reshape(-1))
    small = small.at[3, 0:SECOND_HIDDEN].set(params["bn_beta"].reshape(-1))
    small = small.at[4, 0:THIRD].set(params["b_pb"].reshape(-1))
    small = small.at[5, 0:THIRD].set(params["b_ab"].reshape(-1))
    small = small.at[6, 0:THIRD].set(params["b_cb"].reshape(-1))
    small = small.at[7, 0:A].set(params["b_ah"].reshape(-1))
    small = small.at[7, A + 4].set(params["b_ch"].reshape(-1)[0])
    # NOTE: b_in / b_h are intentionally NOT packed (they cancel under batch-stat BN).

    bf16 = lambda w: w.astype(jnp.bfloat16)
    return {
        "w_in": bf16(w_in), "w_h": bf16(w_h), "w_pb": bf16(w_pb),
        "w_ab": bf16(w_ab), "w_cb": bf16(w_cb),
        "w_ha": bf16(w_ha), "w_hc": bf16(w_hc),
        "small": small,            # biases / BN affine stay f32
    }


# -----------------------------------------------------------------------------
# Beta-distribution glue (plain JAX): sampling, log_prob, entropy on (B, 2).
# -----------------------------------------------------------------------------
def _beta_log_prob(a, b, x):
    return ((a - 1.0) * jnp.log(x)
            + (b - 1.0) * jnp.log1p(-x)
            - (gammaln(a) + gammaln(b) - gammaln(a + b)))


def _beta_entropy(a, b):
    return (gammaln(a) + gammaln(b) - gammaln(a + b)
            - (a - 1.0) * digamma(a)
            - (b - 1.0) * digamma(b)
            + (a + b - 2.0) * digamma(a + b))


def ppo_forward(packed, state, input_size, action_size, action=None, key=None):
    x = state.reshape(-1, input_size).astype(jnp.float32)
    heads = _run_ppo_kernel(x, packed, action_size)

    A = action_size
    mean  = heads[:, 0:A]
    alpha = heads[:, A:A + 2]
    beta  = heads[:, A + 2:A + 4]
    value = heads[:, A + 4:A + 5]

    if action is None:
        # TODO(synk): Beta sampling has no Pallas equivalent; done with jax.random.
        action = jax.random.beta(key, alpha, beta)
        # guard against f32 samples rounding to exactly 0 or 1 (log_prob -> -inf)
        action = jnp.clip(action, 1e-6, 1.0 - 1e-6)

    log_prob = _beta_log_prob(alpha, beta, action).sum(-1)[..., None]
    entropy = _beta_entropy(alpha, beta).sum(-1)[..., None]
    return {"a": action, "log_pi_a": log_prob, "ent": entropy, "mean": mean, "v": value}


# -----------------------------------------------------------------------------
# Pure-JAX reference of the (bf16-weight) forward, for correctness checking.
# Faithful to the original module (includes b_in / b_h, un-fused bodies/heads).
# -----------------------------------------------------------------------------
def _reference_forward(params, x):
    def mm(a, w):
        return jnp.dot(a.astype(jnp.bfloat16), w.astype(jnp.bfloat16),
                       preferred_element_type=jnp.float32)

    def bn(h, g, b):
        mu = jnp.mean(h, axis=0, keepdims=True)
        var = jnp.mean((h - mu) ** 2, axis=0, keepdims=True)
        return (h - mu) / jnp.sqrt(var + BN_EPS) * g + b

    def lrelu(h):
        return jnp.where(h > 0.0, h, LEAKY_SLOPE * h)

    def sp(h):
        return jnp.maximum(h, 0.0) + jnp.log(1.0 + jnp.exp(-jnp.abs(h)))

    h = lrelu(bn(mm(x, params["w_in"]) + params["b_in"],
                 params["bn_in_gamma"], params["bn_in_beta"]))
    h = lrelu(bn(mm(h, params["w_h"]) + params["b_h"],
                 params["bn_gamma"], params["bn_beta"]))
    h = lrelu(mm(h, params["w_pb"]) + params["b_pb"])
    act_x = jnp.tanh(mm(h, params["w_ab"]) + params["b_ab"])
    mean = jnp.tanh(mm(act_x, params["w_ah"]) + params["b_ah"])
    alpha = sp(mm(act_x, params["w_alpha"])) + 1.0
    beta = sp(mm(act_x, params["w_beta"])) + 1.0
    critic_x = lrelu(mm(h, params["w_cb"]) + params["b_cb"])
    value = mm(critic_x, params["w_ch"]) + params["b_ch"]
    return mean, value, alpha, beta


# -----------------------------------------------------------------------------
# Deterministic parameter construction (shapes match nn.Module.__init__).
# -----------------------------------------------------------------------------
def init_params(key, state_size, action_size, hidden_size):
    input_size = state_size * FRAMES
    keys = iter(jax.random.split(key, 32))

    def kaiming(shape):  # (in, out) layout; fan_in = shape[0]
        return (jax.random.normal(next(keys), shape, jnp.float32)
                * jnp.sqrt(2.0 / shape[0]))

    def default_lin(shape):
        bound = 1.0 / jnp.sqrt(jnp.float32(shape[0]))
        return jax.random.uniform(next(keys), shape, jnp.float32, -bound, bound)

    def bias(n, scale=1.0):
        bound = 1.0 / jnp.sqrt(jnp.float32(n))
        return (jax.random.uniform(next(keys), (1, n), jnp.float32, -bound, bound)
                * scale)

    return {
        # kaiming-initialized layers (bias * 0.1, as in init_weights)
        "w_in": kaiming((input_size, hidden_size)), "b_in": bias(hidden_size, 0.1),
        "w_h": kaiming((hidden_size, SECOND_HIDDEN)), "b_h": bias(SECOND_HIDDEN, 0.1),
        "w_pb": kaiming((SECOND_HIDDEN, THIRD)), "b_pb": bias(THIRD, 0.1),
        "w_ab": kaiming((THIRD, THIRD)), "b_ab": bias(THIRD, 0.1),
        "w_cb": kaiming((THIRD, THIRD)), "b_cb": bias(THIRD, 0.1),
        # default-initialized heads
        "w_ah": default_lin((THIRD, action_size)), "b_ah": bias(action_size),
        "w_ch": default_lin((THIRD, 1)), "b_ch": bias(1),
        # alpha / beta: no bias, weights scaled by 0.125
        "w_alpha": default_lin((THIRD, 2)) * 0.125,
        "w_beta": default_lin((THIRD, 2)) * 0.125,
        # BatchNorm affine params
        "bn_in_gamma": jnp.ones((1, hidden_size), jnp.float32),
        "bn_in_beta": jnp.zeros((1, hidden_size), jnp.float32),
        "bn_gamma": jnp.ones((1, SECOND_HIDDEN), jnp.float32),
        "bn_beta": jnp.zeros((1, SECOND_HIDDEN), jnp.float32),
    }


if __name__ == "__main__":
    state_size = 8
    action_size = 2
    hidden_size = 32
    batch = 8
    input_size = state_size * FRAMES  # 24

    root = jax.random.PRNGKey(0)
    pkey, skey, akey = jax.random.split(root, 3)

    params = init_params(pkey, state_size, action_size, hidden_size)
    packed = pack_params(params, hidden_size, action_size)
    state = jax.random.normal(skey, (batch, input_size), jnp.float32)

    out = ppo_forward(packed, state, input_size, action_size, action=None, key=akey)
    out = jax.tree_util.tree_map(jax.block_until_ready, out)

    assert out["a"].shape == (batch, 2)
    assert out["log_pi_a"].shape == (batch, 1)
    assert out["ent"].shape == (batch, 1)
    assert out["mean"].shape == (batch, action_size)
    assert out["v"].shape == (batch, 1)
    assert all(bool(jnp.all(jnp.isfinite(v))) for v in out.values())

    # fused kernel vs plain-JAX (same bf16 weights) reference
    heads = jax.block_until_ready(_run_ppo_kernel(state, packed, action_size))
    ref_mean, ref_value, ref_alpha, ref_beta = _reference_forward(params, state)
    A = action_size
    assert jnp.allclose(heads[:, 0:A], ref_mean, atol=3e-2, rtol=3e-2)
    assert jnp.allclose(heads[:, A:A + 2], ref_alpha, atol=3e-2, rtol=3e-2)
    assert jnp.allclose(heads[:, A + 2:A + 4], ref_beta, atol=3e-2, rtol=3e-2)
    assert jnp.allclose(heads[:, A + 4:A + 5], ref_value, atol=3e-2, rtol=3e-2)

    print("KERNEL_OK")
</pallas_src>

<mosaic_0001>
module attributes {stable_mosaic.version = 11 : i64} {
  func.func @_ppo_kernel(%arg0: memref<8x24xf32, #tpu.memory_space<vmem>>, %arg1: memref<24x128xbf16, #tpu.memory_space<vmem>>, %arg2: memref<128x512xbf16, #tpu.memory_space<vmem>>, %arg3: memref<512x512xbf16, #tpu.memory_space<vmem>>, %arg4: memref<512x512xbf16, #tpu.memory_space<vmem>>, %arg5: memref<512x512xbf16, #tpu.memory_space<vmem>>, %arg6: memref<512x128xbf16, #tpu.memory_space<vmem>>, %arg7: memref<512x128xbf16, #tpu.memory_space<vmem>>, %arg8: memref<8x512xf32, #tpu.memory_space<vmem>>, %arg9: memref<8x128xf32, #tpu.memory_space<vmem>>) attributes {dimension_semantics = [], scalar_prefetch = 0 : i64, scratch_operands = 0 : i64, tpu.core_type = #tpu.core_type<tc>} {
    %c0 = arith.constant 0 : index
    %c0_0 = arith.constant 0 : index
    %0 = vector.load %arg8[%c0, %c0_0] : memref<8x512xf32, #tpu.memory_space<vmem>>, vector<1x128xf32>
    %c1 = arith.constant 1 : index
    %c0_1 = arith.constant 0 : index
    %1 = vector.load %arg8[%c1, %c0_1] : memref<8x512xf32, #tpu.memory_space<vmem>>, vector<1x128xf32>
    %c2 = arith.constant 2 : index
    %c0_2 = arith.constant 0 : index
    %2 = vector.load %arg8[%c2, %c0_2] : memref<8x512xf32, #tpu.memory_space<vmem>>, vector<1x512xf32>
    %c3 = arith.constant 3 : index
    %c0_3 = arith.constant 0 : index
    %3 = vector.load %arg8[%c3, %c0_3] : memref<8x512xf32, #tpu.memory_space<vmem>>, vector<1x512xf32>
    %c4 = arith.constant 4 : index
    %c0_4 = arith.constant 0 : index
    %4 = vector.load %arg8[%c4, %c0_4] : memref<8x512xf32, #tpu.memory_space<vmem>>, vector<1x512xf32>
    %c5 = arith.constant 5 : index
    %c0_5 = arith.constant 0 : index
    %5 = vector.load %arg8[%c5, %c0_5] : memref<8x512xf32, #tpu.memory_space<vmem>>, vector<1x512xf32>
    %c6 = arith.constant 6 : index
    %c0_6 = arith.constant 0 : index
    %6 = vector.load %arg8[%c6, %c0_6] : memref<8x512xf32, #tpu.memory_space<vmem>>, vector<1x512xf32>
    %c7 = arith.constant 7 : index
    %c0_7 = arith.constant 0 : index
    %7 = vector.load %arg8[%c7, %c0_7] : memref<8x512xf32, #tpu.memory_space<vmem>>, vector<1x128xf32>
    %c0_8 = arith.constant 0 : index
    %c0_9 = arith.constant 0 : index
    %8 = vector.load %arg0[%c0_8, %c0_9] : memref<8x24xf32, #tpu.memory_space<vmem>>, vector<8x24xf32>
    %9 = arith.truncf %8 : vector<8x24xf32> to vector<8x24xbf16>
    %c0_10 = arith.constant 0 : index
    %c0_11 = arith.constant 0 : index
    %10 = vector.load %arg1[%c0_10, %c0_11] : memref<24x128xbf16, #tpu.memory_space<vmem>>, vector<24x128xbf16>
    %cst = arith.constant dense<0.000000e+00> : vector<8x128xf32>
    %11 = tpu.matmul %9, %10, %cst {dimension_numbers = #tpu.dot_dimension_numbers<[1], [0], [0], [1], [0, 0, 1, 1], [], []>} : vector<8x24xbf16>, vector<24x128xbf16>, vector<8x128xf32> -> vector<8x128xf32>
    %cst_12 = arith.constant dense<0.000000e+00> : vector<128xf32>
    %12 = vector.multi_reduction <add>, %11, %cst_12 [0] : vector<8x128xf32> to vector<128xf32>
    %13 = vector.shape_cast %12 : vector<128xf32> to vector<1x128xf32>
    %cst_13 = arith.constant 8.000000e+00 : f32
    %14 = vector.broadcast %cst_13 : f32 to vector<1x128xf32>
    %15 = arith.divf %13, %14 : vector<1x128xf32>
    %16 = vector.broadcast %15 : vector<1x128xf32> to vector<8x128xf32>
    %17 = arith.subf %11, %16 : vector<8x128xf32>
    %18 = arith.mulf %17, %17 : vector<8x128xf32>
    %cst_14 = arith.constant dense<0.000000e+00> : vector<128xf32>
    %19 = vector.multi_reduction <add>, %18, %cst_14 [0] : vector<8x128xf32> to vector<128xf32>
    %20 = vector.shape_cast %19 : vector<128xf32> to vector<1x128xf32>
    %cst_15 = arith.constant 8.000000e+00 : f32
    %21 = vector.broadcast %cst_15 : f32 to vector<1x128xf32>
    %22 = arith.divf %20, %21 : vector<1x128xf32>
    %cst_16 = arith.constant 9.99999974E-6 : f32
    %23 = vector.broadcast %cst_16 : f32 to vector<1x128xf32>
    %24 = arith.addf %22, %23 : vector<1x128xf32>
    %25 = math.rsqrt %24 : vector<1x128xf32>
    %26 = arith.mulf %0, %25 : vector<1x128xf32>
    %27 = vector.broadcast %26 : vector<1x128xf32> to vector<8x128xf32>
    %28 = arith.mulf %17, %27 : vector<8x128xf32>
    %29 = vector.broadcast %1 : vector<1x128xf32> to vector<8x128xf32>
    %30 = arith.addf %28, %29 : vector<8x128xf32>
    %cst_17 = arith.constant 0.00999999977 : f32
    %31 = vector.broadcast %cst_17 : f32 to vector<8x128xf32>
    %32 = arith.mulf %31, %30 : vector<8x128xf32>
    %33 = arith.maximumf %30, %32 : vector<8x128xf32>
    %34 = arith.truncf %33 : vector<8x128xf32> to vector<8x128xbf16>
    %c0_18 = arith.constant 0 : index
    %c0_19 = arith.constant 0 : index
    %35 = vector.load %arg2[%c0_18, %c0_19] : memref<128x512xbf16, #tpu.memory_space<vmem>>, vector<128x512xbf16>
    %cst_20 = arith.constant dense<0.000000e+00> : vector<8x512xf32>
    %36 = tpu.matmul %34, %35, %cst_20 {dimension_numbers = #tpu.dot_dimension_numbers<[1], [0], [0], [1], [0, 0, 1, 1], [], []>} : vector<8x128xbf16>, vector<128x512xbf16>, vector<8x512xf32> -> vector<8x512xf32>
    %cst_21 = arith.constant dense<0.000000e+00> : vector<512xf32>
    %37 = vector.multi_reduction <add>, %36, %cst_21 [0] : vector<8x512xf32> to vector<512xf32>
    %38 = vector.shape_cast %37 : vector<512xf32> to vector<1x512xf32>
    %cst_22 = arith.constant 8.000000e+00 : f32
    %39 = vector.broadcast %cst_22 : f32 to vector<1x512xf32>
    %40 = arith.divf %38, %39 : vector<1x512xf32>
    %41 = vector.broadcast %40 : vector<1x512xf32> to vector<8x512xf32>
    %42 = arith.subf %36, %41 : vector<8x512xf32>
    %43 = arith.mulf %42, %42 : vector<8x512xf32>
    %cst_23 = arith.constant dense<0.000000e+00> : vector<512xf32>
    %44 = vector.multi_reduction <add>, %43, %cst_23 [0] : vector<8x512xf32> to vector<512xf32>
    %45 = vector.shape_cast %44 : vector<512xf32> to vector<1x512xf32>
    %cst_24 = arith.constant 8.000000e+00 : f32
    %46 = vector.broadcast %cst_24 : f32 to vector<1x512xf32>
    %47 = arith.divf %45, %46 : vector<1x512xf32>
    %cst_25 = arith.constant 9.99999974E-6 : f32
    %48 = vector.broadcast %cst_25 : f32 to vector<1x512xf32>
    %49 = arith.addf %47, %48 : vector<1x512xf32>
    %50 = math.rsqrt %49 : vector<1x512xf32>
    %51 = arith.mulf %2, %50 : vector<1x512xf32>
    %52 = vector.broadcast %51 : vector<1x512xf32> to vector<8x512xf32>
    %53 = arith.mulf %42, %52 : vector<8x512xf32>
    %54 = vector.broadcast %3 : vector<1x512xf32> to vector<8x512xf32>
    %55 = arith.addf %53, %54 : vector<8x512xf32>
    %cst_26 = arith.constant 0.00999999977 : f32
    %56 = vector.broadcast %cst_26 : f32 to vector<8x512xf32>
    %57 = arith.mulf %56, %55 : vector<8x512xf32>
    %58 = arith.maximumf %55, %57 : vector<8x512xf32>
    %59 = arith.truncf %58 : vector<8x512xf32> to vector<8x512xbf16>
    %c0_27 = arith.constant 0 : index
    %c0_28 = arith.constant 0 : index
    %60 = vector.load %arg3[%c0_27, %c0_28] : memref<512x512xbf16, #tpu.memory_space<vmem>>, vector<512x512xbf16>
    %cst_29 = arith.constant dense<0.000000e+00> : vector<8x512xf32>
    %61 = tpu.matmul %59, %60, %cst_29 {dimension_numbers = #tpu.dot_dimension_numbers<[1], [0], [0], [1], [0, 0, 1, 1], [], []>} : vector<8x512xbf16>, vector<512x512xbf16>, vector<8x512xf32> -> vector<8x512xf32>
    %62 = vector.broadcast %4 : vector<1x512xf32> to vector<8x512xf32>
    %63 = arith.addf %61, %62 : vector<8x512xf32>
    %cst_30 = arith.constant 0.00999999977 : f32
    %64 = vector.broadcast %cst_30 : f32 to vector<8x512xf32>
    %65 = arith.mulf %64, %63 : vector<8x512xf32>
    %66 = arith.maximumf %63, %65 : vector<8x512xf32>
    %67 = arith.truncf %66 : vector<8x512xf32> to vector<8x512xbf16>
    %c0_31 = arith.constant 0 : index
    %c0_32 = arith.constant 0 : index
    %68 = vector.load %arg4[%c0_31, %c0_32] : memref<512x512xbf16, #tpu.memory_space<vmem>>, vector<512x512xbf16>
    %cst_33 = arith.constant dense<0.000000e+00> : vector<8x512xf32>
    %69 = tpu.matmul %67, %68, %cst_33 {dimension_numbers = #tpu.dot_dimension_numbers<[1], [0], [0], [1], [0, 0, 1, 1], [], []>} : vector<8x512xbf16>, vector<512x512xbf16>, vector<8x512xf32> -> vector<8x512xf32>
    %70 = vector.broadcast %5 : vector<1x512xf32> to vector<8x512xf32>
    %71 = arith.addf %69, %70 : vector<8x512xf32>
    %72 = math.tanh %71 : vector<8x512xf32>
    %73 = arith.truncf %66 : vector<8x512xf32> to vector<8x512xbf16>
    %c0_34 = arith.constant 0 : index
    %c0_35 = arith.constant 0 : index
    %74 = vector.load %arg5[%c0_34, %c0_35] : memref<512x512xbf16, #tpu.memory_space<vmem>>, vector<512x512xbf16>
    %cst_36 = arith.constant dense<0.000000e+00> : vector<8x512xf32>
    %75 = tpu.matmul %73, %74, %cst_36 {dimension_numbers = #tpu.dot_dimension_numbers<[1], [0], [0], [1], [0, 0, 1, 1], [], []>} : vector<8x512xbf16>, vector<512x512xbf16>, vector<8x512xf32> -> vector<8x512xf32>
    %76 = vector.broadcast %6 : vector<1x512xf32> to vector<8x512xf32>
    %77 = arith.addf %75, %76 : vector<8x512xf32>
    %cst_37 = arith.constant 0.00999999977 : f32
    %78 = vector.broadcast %cst_37 : f32 to vector<8x512xf32>
    %79 = arith.mulf %78, %77 : vector<8x512xf32>
    %80 = arith.maximumf %77, %79 : vector<8x512xf32>
    %81 = arith.truncf %72 : vector<8x512xf32> to vector<8x512xbf16>
    %c0_38 = arith.constant 0 : index
    %c0_39 = arith.constant 0 : index
    %82 = vector.load %arg6[%c0_38, %c0_39] : memref<512x128xbf16, #tpu.memory_space<vmem>>, vector<512x128xbf16>
    %cst_40 = arith.constant dense<0.000000e+00> : vector<8x128xf32>
    %83 = tpu.matmul %81, %82, %cst_40 {dimension_numbers = #tpu.dot_dimension_numbers<[1], [0], [0], [1], [0, 0, 1, 1], [], []>} : vector<8x512xbf16>, vector<512x128xbf16>, vector<8x128xf32> -> vector<8x128xf32>
    %84 = arith.truncf %80 : vector<8x512xf32> to vector<8x512xbf16>
    %c0_41 = arith.constant 0 : index
    %c0_42 = arith.constant 0 : index
    %85 = vector.load %arg7[%c0_41, %c0_42] : memref<512x128xbf16, #tpu.memory_space<vmem>>, vector<512x128xbf16>
    %cst_43 = arith.constant dense<0.000000e+00> : vector<8x128xf32>
    %86 = tpu.matmul %84, %85, %cst_43 {dimension_numbers = #tpu.dot_dimension_numbers<[1], [0], [0], [1], [0, 0, 1, 1], [], []>} : vector<8x512xbf16>, vector<512x128xbf16>, vector<8x128xf32> -> vector<8x128xf32>
    %87 = arith.addf %83, %86 : vector<8x128xf32>
    %88 = vector.broadcast %7 : vector<1x128xf32> to vector<8x128xf32>
    %89 = arith.addf %87, %88 : vector<8x128xf32>
    %90 = tpu.iota {dimensions = array<i32: 1>} : vector<8x128xi32>
    %c2_i32 = arith.constant 2 : i32
    %91 = vector.broadcast %c2_i32 : i32 to vector<8x128xi32>
    %92 = arith.cmpi slt, %90, %91 : vector<8x128xi32>
    %93 = math.tanh %89 : vector<8x128xf32>
    %c6_i32 = arith.constant 6 : i32
    %94 = vector.broadcast %c6_i32 : i32 to vector<8x128xi32>
    %95 = arith.cmpi slt, %90, %94 : vector<8x128xi32>
    %cst_44 = arith.constant 0.000000e+00 : f32
    %96 = vector.broadcast %cst_44 : f32 to vector<8x128xf32>
    %97 = arith.maximumf %89, %96 : vector<8x128xf32>
    %98 = math.absf %89 : vector<8x128xf32>
    %cst_45 = arith.constant 0.000000e+00 : f32
    %99 = vector.broadcast %cst_45 : f32 to vector<8x128xf32>
    %100 = arith.subf %99, %98 : vector<8x128xf32>
    %101 = math.exp %100 : vector<8x128xf32>
    %cst_46 = arith.constant 1.000000e+00 : f32
    %102 = vector.broadcast %cst_46 : f32 to vector<8x128xf32>
    %103 = arith.addf %102, %101 : vector<8x128xf32>
    %104 = math.log %103 : vector<8x128xf32>
    %105 = arith.addf %97, %104 : vector<8x128xf32>
    %cst_47 = arith.constant 1.000000e+00 : f32
    %106 = vector.broadcast %cst_47 : f32 to vector<8x128xf32>
    %107 = arith.addf %105, %106 : vector<8x128xf32>
    %108 = arith.select %95, %107, %89 : vector<8x128xi1>, vector<8x128xf32>
    %109 = arith.select %92, %93, %108 : vector<8x128xi1>, vector<8x128xf32>
    %c0_48 = arith.constant 0 : index
    %c0_49 = arith.constant 0 : index
    %110 = vector.load %arg9[%c0_48, %c0_49] : memref<8x128xf32, #tpu.memory_space<vmem>>, vector<8x128xf32>
    tpu.vector_store %arg9[%c0_48, %c0_49], %109 {strides = array<i32>} : memref<8x128xf32, #tpu.memory_space<vmem>>, vector<8x128xf32>,
    return
  }
}

</mosaic_0001>

<bundles_post_ra>
// kernel: tpu_custom_call.1
= control target key start
LH: loop header
LB: loop body
LE: loop exit
PB: predicated region body
PF: predicated region fallthrough
CT: control target
= control target key end

     0   :  { %14 = vsyncpa [#allocation3], 0  ;;  %s6181_s0 = inlined_call_operand.hbm [shape: f32[8,24], index: 0, kind: input, shape index: {}]   ;;  %s6182_s1 = inlined_call_operand.hbm [shape: bf16[24,128], index: 1, kind: input, shape index: {}]   ;;  %s6183_s2 = inlined_call_operand.hbm [shape: bf16[128,512], index: 2, kind: input, shape index: {}]   ;;  %s6184_s3 = inlined_call_operand.hbm [shape: bf16[512,512], index: 3, kind: input, shape index: {}]   ;;  %s6185_s4 = inlined_call_operand.hbm [shape: bf16[512,512], index: 4, kind: input, shape index: {}]   ;;  %s6186_s5 = inlined_call_operand.hbm [shape: bf16[512,512], index: 5, kind: input, shape index: {}]   ;;  %s6187_s6 = inlined_call_operand.hbm [shape: bf16[512,128], index: 6, kind: input, shape index: {}]   ;;  %s6188_s7 = inlined_call_operand.hbm [shape: bf16[512,128], index: 7, kind: input, shape index: {}]   ;;  %s6189_s8 = inlined_call_operand.hbm [shape: f32[8,512], index: 8, kind: input, shape index: {}]   ;;  %s6190_s9 = inlined_call_operand.hbm [shape: f32[8,128], index: 9, kind: output, shape index: {}]  }
   0x1   :  { %15 = vsyncpa [#allocation6], 0 }
   0x2   :  { %16 = vsyncpa [#allocation9], 0 }
   0x3   :  { %17 = vsyncpa [#allocation12], 0 }
   0x4   :  { %18 = vsyncpa [#allocation15], 0 }
   0x5   :  { %19 = vsyncpa [#allocation4], 0  ;;  %s5873_s30 = smov [#allocation5]   ;;  %s5641_s13 = scalar_lea.hbm %s6182_s1, 192 }
   0x6   :  { %s35_s10 = sshll.u32 %s5873_s30, 4  ;;  %p5642_p0 = scmp.ne.s32.totalorder %s6182_s1, %s5641_s13  ;;  %s36_s10 = int_to_ptr.vmem [resolvable:$true] %s35_s10 }
   0x7   :  { %p5645_p1 = scmp.lt.u32.totalorder %s5641_s13, %s6182_s1 }
   0x9   :  { %p5647_p2 = pnand %p5645_p1, %p5642_p0 }
   0xb   :  { %5650 = shalt.err (!%p5647_p2)
}
   0xc   :  { %s5651_s18 = scalar_lea.vmem %s36_s10, 192  ;;  %p5656_p4 = scmp.lt.s32.totalorder %s36_s10, %s36_s10 }
   0xd   :  { %p5652_p3 = scmp.ne.s32.totalorder %s36_s10, %s5651_s18  ;;  %p5657_p5 = scmp.lt.s32.totalorder %s5651_s18, %s5651_s18 }
   0xf   :  { %p5658_p6 = por %p5657_p5, %p5656_p4 }
  0x11   :  { %p5659_p7 = pnand %p5658_p6, %p5652_p3 }
  0x13   :  { %5662 = shalt.err (!%p5659_p7)
}
  0x14   :  { %s5874_s19 = smov 64   ;;  %s5875_s20 = smov 4  }
  0x15   :  { %41 = dma.hbm_to_vmem [thread:$0]  %s6182_s1, 192, %s36_s10, [#allocation6], %s5874_s19, %s5874_s19, %s5875_s20  }
  0x16   :  { %s5876_s23 = smov [#allocation8]   ;;  %s5877_s25 = smov [#allocation11]  }
  0x17   :  { %s59_s24 = sshll.u32 %s5876_s23, 4  ;;  %s83_s26 = sshll.u32 %s5877_s25, 4  ;;  %s60_s24 = int_to_ptr.vmem [resolvable:$true] %s59_s24  ;;  %s84_s26 = int_to_ptr.vmem [resolvable:$true] %s83_s26 }
  0x18   :  { %s5663_s29 = scalar_lea.hbm %s6184_s3, 16384 }
  0x19   :  { %p5664_p8 = scmp.ne.s32.totalorder %s6184_s3, %s5663_s29  ;;  %p5667_p9 = scmp.lt.u32.totalorder %s5663_s29, %s6184_s3 }
  0x1b   :  { %p5669_p10 = pnand %p5667_p9, %p5664_p8 }
  0x1d   :  { %5672 = shalt.err (!%p5669_p10)
}
  0x1e   :  { %s5673_s1 = scalar_lea.vmem %s60_s24, 16384  ;;  %p5678_p12 = scmp.lt.s32.totalorder %s60_s24, %s60_s24 }
  0x1f   :  { %p5674_p11 = scmp.ne.s32.totalorder %s60_s24, %s5673_s1  ;;  %p5679_p13 = scmp.lt.s32.totalorder %s5673_s1, %s5673_s1 }
  0x21   :  { %p5680_p0 = por %p5679_p13, %p5678_p12 }
  0x23   :  { %p5681_p1 = pnand %p5680_p0, %p5674_p11 }
  0x25   :  { %5684 = shalt.err (!%p5681_p1)
}
  0x26   :  { %s5878_s10 = smov 256   ;;  %s5879_s14 = smov 16  }
  0x27   :  { %65 = dma.hbm_to_vmem [thread:$0]  %s6184_s3, 16384, %s60_s24, [#allocation9], %s5878_s10, %s5878_s10, %s5879_s14  }
  0x28   :  { %s5685_s21 = scalar_lea.hbm %s6186_s5, 16384 }
  0x29   :  { %p5686_p2 = scmp.ne.s32.totalorder %s6186_s5, %s5685_s21  ;;  %p5689_p3 = scmp.lt.u32.totalorder %s5685_s21, %s6186_s5 }
  0x2b   :  { %p5691_p4 = pnand %p5689_p3, %p5686_p2 }
  0x2d   :  { %5694 = shalt.err (!%p5691_p4)
}
  0x2e   :  { %s5695_s28 = scalar_lea.vmem %s84_s26, 16384  ;;  %p5700_p6 = scmp.lt.s32.totalorder %s84_s26, %s84_s26 }
  0x2f   :  { %p5696_p5 = scmp.ne.s32.totalorder %s84_s26, %s5695_s28  ;;  %p5701_p7 = scmp.lt.s32.totalorder %s5695_s28, %s5695_s28 }
  0x31   :  { %p5702_p8 = por %p5701_p7, %p5700_p6 }
  0x33   :  { %p5703_p9 = pnand %p5702_p8, %p5696_p5 }
  0x35   :  { %5706 = shalt.err (!%p5703_p9)
}
  0x36   :  { %89 = dma.hbm_to_vmem [thread:$0]  %s6186_s5, 16384, %s84_s26, [#allocation12], %s5878_s10, %s5878_s10, %s5879_s14  }
  0x37   :  { %s5880_s29 = smov [#allocation14]   ;;  %s5881_s11 = smov [#allocation2]  }
  0x38   :  { %s107_s30 = sshll.u32 %s5880_s29, 4  ;;  %s26_s12 = sshll.u32 %s5881_s11, 4  ;;  %s108_s30 = int_to_ptr.vmem [resolvable:$true] %s107_s30  ;;  %s27_s12 = int_to_ptr.vmem [resolvable:$true] %s26_s12 }
  0x39   :  { %s5707_s15 = scalar_lea.hbm %s6188_s7, 4096 }
  0x3a   :  { %p5708_p10 = scmp.ne.s32.totalorder %s6188_s7, %s5707_s15  ;;  %p5711_p11 = scmp.lt.u32.totalorder %s5707_s15, %s6188_s7 }
  0x3c   :  { %p5713_p12 = pnand %p5711_p11, %p5708_p10 }
  0x3e   :  { %5716 = shalt.err (!%p5713_p12)
}
  0x3f   :  { %s5717_s5 = scalar_lea.vmem %s108_s30, 4096  ;;  %p5722_p0 = scmp.lt.s32.totalorder %s108_s30, %s108_s30 }
  0x40   :  { %p5718_p13 = scmp.ne.s32.totalorder %s108_s30, %s5717_s5  ;;  %p5723_p1 = scmp.lt.s32.totalorder %s5717_s5, %s5717_s5 }
  0x42   :  { %p5724_p2 = por %p5723_p1, %p5722_p0 }
  0x44   :  { %p5725_p3 = pnand %p5724_p2, %p5718_p13 }
  0x46   :  { %5728 = shalt.err (!%p5725_p3)
}
  0x47   :  { %113 = dma.hbm_to_vmem [thread:$0]  %s6188_s7, 4096, %s108_s30, [#allocation15], %s5874_s19, %s5874_s19, %s5875_s20  }
  0x48   :  { %s5729_s27 = scalar_lea.hbm %s6181_s0, 128 }
  0x49   :  { %p5730_p4 = scmp.ne.s32.totalorder %s6181_s0, %s5729_s27  ;;  %p5733_p5 = scmp.lt.u32.totalorder %s5729_s27, %s6181_s0 }
  0x4b   :  { %p5735_p6 = pnand %p5733_p5, %p5730_p4 }
  0x4d   :  { %5738 = shalt.err (!%p5735_p6)
}
  0x4e   :  { %s5739_s11 = scalar_lea.vmem %s27_s12, 128  ;;  %p5744_p8 = scmp.lt.s32.totalorder %s27_s12, %s27_s12 }
  0x4f   :  { %p5740_p7 = scmp.ne.s32.totalorder %s27_s12, %s5739_s11  ;;  %p5745_p9 = scmp.lt.s32.totalorder %s5739_s11, %s5739_s11 }
  0x51   :  { %p5746_p10 = por %p5745_p9, %p5744_p8 }
  0x53   :  { %p5747_p11 = pnand %p5746_p10, %p5740_p7 }
  0x55   :  { %5750 = shalt.err (!%p5747_p11)
}
  0x56   :  { %29 = dma.hbm_to_vmem [thread:$0]  %s6181_s0, 128, %s27_s12, [#allocation3]  }
  0x57   :  { %s5882_s13 = smov [#allocation7]   ;;  %s5883_s15 = smov [#allocation10]  }
  0x58   :  { %s47_s1 = sshll.u32 %s5882_s13, 4  ;;  %s71_s16 = sshll.u32 %s5883_s15, 4  ;;  %s48_s1 = int_to_ptr.vmem [resolvable:$true] %s47_s1  ;;  %s72_s16 = int_to_ptr.vmem [resolvable:$true] %s71_s16 }
  0x59   :  { %s5751_s21 = scalar_lea.hbm %s6183_s2, 4096 }
  0x5a   :  { %p5752_p12 = scmp.ne.s32.totalorder %s6183_s2, %s5751_s21  ;;  %p5755_p13 = scmp.lt.u32.totalorder %s5751_s21, %s6183_s2 }
  0x5c   :  { %p5757_p0 = pnand %p5755_p13, %p5752_p12 }
  0x5e   :  { %5760 = shalt.err (!%p5757_p0)
}
  0x5f   :  { %s5761_s0 = scalar_lea.vmem %s48_s1, 4096  ;;  %p5766_p2 = scmp.lt.s32.totalorder %s48_s1, %s48_s1 }
  0x60   :  { %p5762_p1 = scmp.ne.s32.totalorder %s48_s1, %s5761_s0  ;;  %p5767_p3 = scmp.lt.s32.totalorder %s5761_s0, %s5761_s0 }
  0x62   :  { %p5768_p4 = por %p5767_p3, %p5766_p2 }
  0x64   :  { %p5769_p5 = pnand %p5768_p4, %p5762_p1 }
  0x66   :  { %5772 = shalt.err (!%p5769_p5)
}
  0x67   :  { %53 = dma.hbm_to_vmem [thread:$0]  %s6183_s2, 4096, %s48_s1, [#allocation6], %s5878_s10, %s5878_s10, %s5879_s14  }
  0x68   :  { %s5773_s3 = scalar_lea.hbm %s6185_s4, 16384 }
  0x69   :  { %p5774_p6 = scmp.ne.s32.totalorder %s6185_s4, %s5773_s3  ;;  %p5777_p7 = scmp.lt.u32.totalorder %s5773_s3, %s6185_s4 }
  0x6b   :  { %p5779_p8 = pnand %p5777_p7, %p5774_p6 }
  0x6d   :  { %5782 = shalt.err (!%p5779_p8)
}
  0x6e   :  { %s5783_s30 = scalar_lea.vmem %s72_s16, 16384  ;;  %p5788_p10 = scmp.lt.s32.totalorder %s72_s16, %s72_s16 }
  0x6f   :  { %p5784_p9 = scmp.ne.s32.totalorder %s72_s16, %s5783_s30  ;;  %p5789_p11 = scmp.lt.s32.totalorder %s5783_s30, %s5783_s30 }
  0x71   :  { %p5790_p12 = por %p5789_p11, %p5788_p10 }
  0x73   :  { %p5791_p13 = pnand %p5790_p12, %p5784_p9 }
  0x75   :  { %5794 = shalt.err (!%p5791_p13)
}
  0x76   :  { %77 = dma.hbm_to_vmem [thread:$0]  %s6185_s4, 16384, %s72_s16, [#allocation9], %s5878_s10, %s5878_s10, %s5879_s14  }
  0x77   :  { %s5884_s1 = smov [#allocation13]   ;;  %s5885_s17 = smov [#allocation16]  }
  0x78   :  { %s95_s15 = sshll.u32 %s5884_s1, 4  ;;  %s120_s18 = sshll.u32 %s5885_s17, 4  ;;  %s96_s15 = int_to_ptr.vmem [resolvable:$true] %s95_s15  ;;  %s121_s18 = int_to_ptr.vmem [resolvable:$true] %s120_s18 }
  0x79   :  { %s5795_s26 = scalar_lea.hbm %s6187_s6, 4096 }
  0x7a   :  { %p5796_p0 = scmp.ne.s32.totalorder %s6187_s6, %s5795_s26  ;;  %p5799_p1 = scmp.lt.u32.totalorder %s5795_s26, %s6187_s6 }
  0x7c   :  { %p5801_p2 = pnand %p5799_p1, %p5796_p0 }
  0x7e   :  { %5804 = shalt.err (!%p5801_p2)
}
  0x7f   :  { %s5805_s4 = scalar_lea.vmem %s96_s15, 4096  ;;  %p5810_p4 = scmp.lt.s32.totalorder %s96_s15, %s96_s15 }
  0x80   :  { %p5806_p3 = scmp.ne.s32.totalorder %s96_s15, %s5805_s4  ;;  %p5811_p5 = scmp.lt.s32.totalorder %s5805_s4, %s5805_s4 }
  0x82   :  { %p5812_p6 = por %p5811_p5, %p5810_p4 }
  0x84   :  { %p5813_p7 = pnand %p5812_p6, %p5806_p3 }
  0x86   :  { %5816 = shalt.err (!%p5813_p7)
}
  0x87   :  { %101 = dma.hbm_to_vmem [thread:$0]  %s6187_s6, 4096, %s96_s15, [#allocation12], %s5874_s19, %s5874_s19, %s5875_s20  }
  0x88   :  { %s5817_s27 = scalar_lea.hbm %s6189_s8, 512 }
  0x89   :  { %p5818_p8 = scmp.ne.s32.totalorder %s6189_s8, %s5817_s27  ;;  %p5821_p9 = scmp.lt.u32.totalorder %s5817_s27, %s6189_s8 }
  0x8b   :  { %p5823_p10 = pnand %p5821_p9, %p5818_p8 }
  0x8d   :  { %5826 = shalt.err (!%p5823_p10)
}
  0x8e   :  { %s5827_s11 = scalar_lea.vmem %s121_s18, 512  ;;  %p5832_p12 = scmp.lt.s32.totalorder %s121_s18, %s121_s18 }
  0x8f   :  { %p5828_p11 = scmp.ne.s32.totalorder %s121_s18, %s5827_s11  ;;  %p5833_p13 = scmp.lt.s32.totalorder %s5827_s11, %s5827_s11 }
  0x91   :  { %p5834_p0 = por %p5833_p13, %p5832_p12 }
  0x93   :  { %p5835_p1 = pnand %p5834_p0, %p5828_p11 }
  0x95   :  { %5838 = shalt.err (!%p5835_p1)
}
  0x96   :  { %123 = dma.hbm_to_vmem [thread:$0]  %s6189_s8, 512, %s121_s18, [#allocation15]  }
  0x97   :  { %5861 = dma.done.wait [#allocation3], 128  }
  0x98   :  { %5862 = vsyncadd [#allocation3], 4294967168 }
  0x99   :  { %5863 = dma.done.wait [#allocation6], 4288  }
  0x9a   :  { %5864 = vsyncadd [#allocation6], 4294963008 }
  0x9b   :  { %5865 = dma.done.wait [#allocation9], 32768  }
  0x9c   :  { %5866 = vsyncadd [#allocation9], 4294934528 }
  0x9d   :  { %5867 = dma.done.wait [#allocation12], 20480  }
  0x9e   :  { %5868 = vsyncadd [#allocation12], 4294946816 }
  0x9f   :  { %5869 = dma.done.wait [#allocation15], 4608  }
  0xa0   :  { %5870 = vsyncadd [#allocation15], 4294962688  ;;  %v5886_v0 = vmov 0.0   ;;  %vm5887_vm0 = vmmov 0   ;;  %v4927_v1 = vld [vmem:[#allocation5] sm:$0xff]   ;;  %vm183_vm1 = vcmask 1043456  }
  0xa1   :  { %4865 = vmatprep.subr.bf16.mxu0 %v5886_v0  ;;  %4869 = vmatprep.mubr.msk.bf16.mxu0 %vm5887_vm0, %v5886_v0  ;;  %v4928_v2 = vld [vmem:[#allocation5 + $0x8] ss:$0 sps:$4 sm:$0xff]   ;;  %v165_v3 = vld [vmem:[#allocation2] sm:$0xff]  ;;  %vm179_vm2 = vcmask 195584   ;;  %v4929_v6 = vld [vmem:[#allocation7 + $0x4] ss:$16 sps:$4 sm:$0xff]  }
  0xa2   :  { %4866 = vmatpush3.bf16.msra.mxu0 %v4927_v1  ;;  %v185_v4 = vsel %vm183_vm1, %v4928_v2, 0  ;;  %v166_v5 = vpack.c.bf16 %v165_v3, %v165_v3  ;;  %v4933_v7 = vld [vmem:[#allocation7 + $0xc] ss:$16 sps:$4 sm:$0xff]   ;;  %v4931_v8 = vld [vmem:[#allocation7 + $0x8] ss:$16 sps:$4 sm:$0xff]   ;;  %444 = vmatprep.subr.bf16.mxu1 %v4929_v6  ;;  %v5888_v38 = vmov 0  }
  0xa3   :  { %4867 = vmatprep.subr.bf16.mxu0 %v5886_v0  ;;  %v4934_v9 = vld [vmem:[#allocation7] ss:$16 sps:$4 sm:$0xff]   ;;  %v4935_v10 = vld [vmem:[#allocation7 + $0x24] ss:$16 sps:$4 sm:$0xff]   ;;  %v4939_v11 = vld [vmem:[#allocation7 + $0x2c] ss:$16 sps:$4 sm:$0xff]   ;;  %476 = vmatprep.mubr.bf16.mxu1 %v5888_v38 }
  0xa4   :  { %445 = vmatpush1.bf16.msra.mxu1 %v4934_v9  ;;  %v4937_v12 = vld [vmem:[#allocation7 + $0x28] ss:$16 sps:$4 sm:$0xff]   ;;  %v4940_v13 = vld [vmem:[#allocation7 + $0x20] ss:$16 sps:$4 sm:$0xff]   ;;  %v4941_v14 = vld [vmem:[#allocation7 + $0x44] ss:$16 sps:$4 sm:$0xff]  }
  0xa5   :  { %446 = vmatprep.subr.bf16.mxu1 %v4935_v10  ;;  %v4945_v15 = vld [vmem:[#allocation7 + $0x4c] ss:$16 sps:$4 sm:$0xff]   ;;  %v4943_v16 = vld [vmem:[#allocation7 + $0x48] ss:$16 sps:$4 sm:$0xff]   ;;  %v4946_v17 = vld [vmem:[#allocation7 + $0x40] ss:$16 sps:$4 sm:$0xff]  }
  0xa6   :  { %4868 = vmatpush3.bf16.msra.mxu0 %v185_v4  ;;  %v4947_v18 = vld [vmem:[#allocation7 + $0x64] ss:$16 sps:$4 sm:$0xff]   ;;  %v4951_v19 = vld [vmem:[#allocation7 + $0x6c] ss:$16 sps:$4 sm:$0xff]   ;;  %v4949_v20 = vld [vmem:[#allocation7 + $0x68] ss:$16 sps:$4 sm:$0xff]  }
  0xa7   :  { %485 = vmatprep.subr.bf16.mxu0 %v4933_v7  ;;  %v4952_v21 = vld [vmem:[#allocation7 + $0x60] ss:$16 sps:$4 sm:$0xff]   ;;  %v4953_v22 = vld [vmem:[#allocation7 + $0x84] ss:$16 sps:$4 sm:$0xff]   ;;  %v4957_v23 = vld [vmem:[#allocation7 + $0x8c] ss:$16 sps:$4 sm:$0xff]  }
  0xa8   :  { %447 = vmatpush1.bf16.msra.mxu1 %v4940_v13  ;;  %v4955_v24 = vld [vmem:[#allocation7 + $0x88] ss:$16 sps:$4 sm:$0xff]   ;;  %v4958_v25 = vld [vmem:[#allocation7 + $0x80] ss:$16 sps:$4 sm:$0xff]   ;;  %v4959_v26 = vld [vmem:[#allocation7 + $0xa4] ss:$16 sps:$4 sm:$0xff]  }
  0xa9   :  { %4870 = vmatmul.mubr.msk.bf16.vlgmr.msra.gmra.mrb[0].mxu0 %vm179_vm2, %v166_v5  ;;  %448 = vmatprep.subr.bf16.mxu1 %v4941_v14  ;;  %v4963_v27 = vld [vmem:[#allocation7 + $0xac] ss:$16 sps:$4 sm:$0xff]   ;;  %v4961_v28 = vld [vmem:[#allocation7 + $0xa8] ss:$16 sps:$4 sm:$0xff]   ;;  %v4964_v29 = vld [vmem:[#allocation7 + $0xa0] ss:$16 sps:$4 sm:$0xff]  }
  0xaa   :  { %486 = vmatpush1.bf16.msra.mxu0 %v4931_v8  ;;  %v4965_v30 = vld [vmem:[#allocation7 + $0xc4] ss:$16 sps:$4 sm:$0xff]   ;;  %v4967_v31 = vld [vmem:[#allocation7 + $0xc8] ss:$16 sps:$4 sm:$0xff]   ;;  %v4969_v32 = vld [vmem:[#allocation7 + $0xcc] ss:$16 sps:$4 sm:$0xff]   ;;  %517 = vmatprep.mubr.bf16.mxu0 %v5888_v38 }
  0xab   :  { %487 = vmatprep.subr.bf16.mxu0 %v4939_v11  ;;  %v4970_v33 = vld [vmem:[#allocation7 + $0xc0] ss:$16 sps:$4 sm:$0xff]   ;;  %v4971_v34 = vld [vmem:[#allocation7 + $0xe4] ss:$16 sps:$4 sm:$0xff]   ;;  %v4973_v35 = vld [vmem:[#allocation7 + $0xe8] ss:$16 sps:$4 sm:$0xff]  }
  0xac   :  { %449 = vmatpush1.bf16.msra.mxu1 %v4946_v17  ;;  %v4975_v36 = vld [vmem:[#allocation7 + $0xec] ss:$16 sps:$4 sm:$0xff]   ;;  %v4976_v37 = vld [vmem:[#allocation7 + $0xe0] ss:$16 sps:$4 sm:$0xff]   ;;  %v4979_v5 = vld [vmem:[#allocation8 + $0x4] ss:$16 sps:$4 sm:$0xff]  }
  0xad   :  { %450 = vmatprep.subr.bf16.mxu1 %v4947_v18  ;;  %v152_v60 = vld [vmem:[#allocation16] ss:$0 sm:$0xff]  ;;  %v153_v63 = vld [vmem:[#allocation16 + $0x1] ss:$0 sm:$0xff]  ;;  %v4982_v6 = vld [vmem:[#allocation8 + $0xc] ss:$16 sps:$4 sm:$0xff]  }
  0xae   :  { %488 = vmatpush1.bf16.msra.mxu0 %v4937_v12  ;;  %v4977_v7 = vld [vmem:[#allocation8] ss:$16 sps:$4 sm:$0xff]   ;;  %v4980_v8 = vld [vmem:[#allocation8 + $0x8] ss:$16 sps:$4 sm:$0xff]   ;;  %v4985_v9 = vld [vmem:[#allocation8 + $0x24] ss:$16 sps:$4 sm:$0xff]  }
  0xaf   :  { %489 = vmatprep.subr.bf16.mxu0 %v4945_v15  ;;  %v4988_v10 = vld [vmem:[#allocation8 + $0x2c] ss:$16 sps:$4 sm:$0xff]   ;;  %v4983_v11 = vld [vmem:[#allocation8 + $0x20] ss:$16 sps:$4 sm:$0xff]   ;;  %v4986_v12 = vld [vmem:[#allocation8 + $0x28] ss:$16 sps:$4 sm:$0xff]  }
  0xb0   :  { %451 = vmatpush1.bf16.msra.mxu1 %v4952_v21  ;;  %v4991_v13 = vld [vmem:[#allocation8 + $0x44] ss:$16 sps:$4 sm:$0xff]   ;;  %v4994_v14 = vld [vmem:[#allocation8 + $0x4c] ss:$16 sps:$4 sm:$0xff]   ;;  %v4989_v15 = vld [vmem:[#allocation8 + $0x40] ss:$16 sps:$4 sm:$0xff]  }
  0xb1   :  { %452 = vmatprep.subr.bf16.mxu1 %v4953_v22  ;;  %v4997_v17 = vld [vmem:[#allocation8 + $0x64] ss:$16 sps:$4 sm:$0xff]   ;;  %v5000_v18 = vld [vmem:[#allocation8 + $0x6c] ss:$16 sps:$4 sm:$0xff]   ;;  %v5025_v38 = vld [vmem:[#allocation8 + $0x100] ss:$16 sps:$4 sm:$0xff]  }
  0xb2   :  { %490 = vmatpush1.bf16.msra.mxu0 %v4943_v16  ;;  %v4992_v16 = vld [vmem:[#allocation8 + $0x48] ss:$16 sps:$4 sm:$0xff]   ;;  %v5003_v21 = vld [vmem:[#allocation8 + $0x84] ss:$16 sps:$4 sm:$0xff]   ;;  %v5006_v22 = vld [vmem:[#allocation8 + $0x8c] ss:$16 sps:$4 sm:$0xff]  }
  0xb3   :  { %491 = vmatprep.subr.bf16.mxu0 %v4951_v19  ;;  %v4995_v19 = vld [vmem:[#allocation8 + $0x60] ss:$16 sps:$4 sm:$0xff]   ;;  %s5890_s8 = smov [#allocation17]  }
  0xb4   :  { %453 = vmatpush1.bf16.msra.mxu1 %v4958_v25  ;;  %v5009_v25 = vld [vmem:[#allocation8 + $0xa4] ss:$16 sps:$4 sm:$0xff]   ;;  %s4278_s20 = sshll.u32 %s5890_s8, 4  ;;  %s4279_s20 = int_to_ptr.vmem [resolvable:$true] %s4278_s20 }
  0xb5   :  { %454 = vmatprep.subr.bf16.mxu1 %v4959_v26  ;;  %v5012_v26 = vld [vmem:[#allocation8 + $0xac] ss:$16 sps:$4 sm:$0xff]   ;;  %s5839_s7 = scalar_lea.vmem %s4279_s20, 128  ;;  %p5844_p3 = scmp.lt.s32.totalorder %s4279_s20, %s4279_s20 }
  0xb6   :  { %492 = vmatpush1.bf16.msra.mxu0 %v4949_v20  ;;  %v4998_v20 = vld [vmem:[#allocation8 + $0x68] ss:$16 sps:$4 sm:$0xff]   ;;  %p5840_p2 = scmp.ne.s32.totalorder %s4279_s20, %s5839_s7  ;;  %p5845_p4 = scmp.lt.s32.totalorder %s5839_s7, %s5839_s7 }
  0xb7   :  { %493 = vmatprep.subr.bf16.mxu0 %v4957_v23  ;;  %v5001_v23 = vld [vmem:[#allocation8 + $0x80] ss:$16 sps:$4 sm:$0xff]  }
  0xb8   :  { %455 = vmatpush1.bf16.msra.mxu1 %v4964_v29  ;;  %v5015_v29 = vld [vmem:[#allocation8 + $0xc4] ss:$16 sps:$4 sm:$0xff]   ;;  %p5846_p5 = por %p5845_p4, %p5844_p3 }
  0xb9   :  { %456 = vmatprep.subr.bf16.mxu1 %v4965_v30  ;;  %v5018_v30 = vld [vmem:[#allocation8 + $0xcc] ss:$16 sps:$4 sm:$0xff]  }
  0xba   :  { %494 = vmatpush1.bf16.msra.mxu0 %v4955_v24  ;;  %v5004_v24 = vld [vmem:[#allocation8 + $0x88] ss:$16 sps:$4 sm:$0xff]   ;;  %p5847_p6 = pnand %p5846_p5, %p5840_p2 }
  0xbb   :  { %495 = vmatprep.subr.bf16.mxu0 %v4963_v27  ;;  %v5007_v27 = vld [vmem:[#allocation8 + $0xa0] ss:$16 sps:$4 sm:$0xff]  }
  0xbc   :  { %457 = vmatpush1.bf16.msra.mxu1 %v4970_v33  ;;  %v5021_v33 = vld [vmem:[#allocation8 + $0xe4] ss:$16 sps:$4 sm:$0xff]  }
  0xbd   :  { %458 = vmatprep.subr.bf16.mxu1 %v4971_v34  ;;  %v5024_v34 = vld [vmem:[#allocation8 + $0xec] ss:$16 sps:$4 sm:$0xff]  }
  0xbe   :  { %496 = vmatpush1.bf16.msra.mxu0 %v4961_v28  ;;  %v5010_v28 = vld [vmem:[#allocation8 + $0xa8] ss:$16 sps:$4 sm:$0xff]  }
  0xbf   :  { %497 = vmatprep.subr.bf16.mxu0 %v4969_v32  ;;  %v5016_v32 = vld [vmem:[#allocation8 + $0xc8] ss:$16 sps:$4 sm:$0xff]  }
  0xc0   :  { %459 = vmatpush1.bf16.msra.mxu1 %v4976_v37  ;;  %v5027_v37 = vld [vmem:[#allocation8 + $0x104] ss:$16 sps:$4 sm:$0xff]  }
  0xc1   :  { %1479 = vmatprep.subr.bf16.mxu1 %v4979_v5  ;;  %v5075_v5 = vld [vmem:[#allocation8 + $0x204] ss:$16 sps:$4 sm:$0xff]  }
  0xc2   :  { %498 = vmatpush1.bf16.msra.mxu0 %v4967_v31  ;;  %v5013_v31 = vld [vmem:[#allocation8 + $0xc0] ss:$16 sps:$4 sm:$0xff]  }
  0xc3   :  { %499 = vmatprep.subr.bf16.mxu0 %v4975_v36  ;;  %v5022_v36 = vld [vmem:[#allocation8 + $0xe8] ss:$16 sps:$4 sm:$0xff]  }
  0xc6   :  { %500 = vmatpush1.bf16.msra.mxu0 %v4973_v35  ;;  %v5019_v35 = vld [vmem:[#allocation8 + $0xe0] ss:$16 sps:$4 sm:$0xff]  }
  0xc7   :  { %1561 = vmatprep.subr.bf16.mxu0 %v4982_v6  ;;  %v5078_v6 = vld [vmem:[#allocation8 + $0x20c] ss:$16 sps:$4 sm:$0xff]  }
 0x17c   :  { %v221_v39 = vpop.f32.mrb[0].mxu0 }
 0x17d   :  { %v227_v40 = vrot.slane %v221_v39, 4  ;;  %v4871_v41 = vpop.f32.mrb[1].mxu0 }
 0x17e   :  { %v224_v42 = vpop.f32.mrb[2].mxu0  ;;  %v5033_v41 = vld [vmem:[#allocation8 + $0x124] ss:$16 sps:$4 sm:$0xff]  }
 0x17f   :  { %v228_v43 = vadd.f32 %v227_v40, %v221_v39  ;;  %v4872_v44 = vpop.f32.mrb[3].mxu0  ;;  %v5030_v40 = vld [vmem:[#allocation8 + $0x10c] ss:$16 sps:$4 sm:$0xff]  }
 0x180   :  { %v5036_v42 = vld [vmem:[#allocation8 + $0x12c] ss:$16 sps:$4 sm:$0xff]   ;;  %v5034_v44 = vld [vmem:[#allocation8 + $0x128] ss:$16 sps:$4 sm:$0xff]  }
 0x181   :  { %v229_v45 = vrot.slane %v228_v43, 2 }
 0x183   :  { %v230_v46 = vadd.f32 %v229_v45, %v228_v43  ;;  %v5031_v43 = vld [vmem:[#allocation8 + $0x120] ss:$16 sps:$4 sm:$0xff]   ;;  %v5039_v45 = vld [vmem:[#allocation8 + $0x144] ss:$16 sps:$4 sm:$0xff]  }
 0x185   :  { %v231_v47 = vrot.slane %v230_v46, 1 }
 0x187   :  { %v232_v48 = vadd.f32 %v231_v47, %v230_v46  ;;  %v5042_v46 = vld [vmem:[#allocation8 + $0x14c] ss:$16 sps:$4 sm:$0xff]   ;;  %v5037_v47 = vld [vmem:[#allocation8 + $0x140] ss:$16 sps:$4 sm:$0xff]  }
 0x189   :  { %v234_v49 = vmul.f32 0.125, %v232_v48  ;;  %v5040_v48 = vld [vmem:[#allocation8 + $0x148] ss:$16 sps:$4 sm:$0xff]  }
 0x18b   :  { %v235_v50 = vsub.f32 %v221_v39, %v234_v49  ;;  %v5028_v39 = vld [vmem:[#allocation8 + $0x108] ss:$16 sps:$4 sm:$0xff]   ;;  %v5045_v49 = vld [vmem:[#allocation8 + $0x164] ss:$16 sps:$4 sm:$0xff]  }
 0x18d   :  { %v236_v51 = vmul.f32 %v235_v50, %v235_v50 }
 0x18f   :  { %v237_v52 = vrot.slane %v236_v51, 4 }
 0x191   :  { %v238_v53 = vadd.f32 %v237_v52, %v236_v51  ;;  %v5043_v51 = vld [vmem:[#allocation8 + $0x160] ss:$16 sps:$4 sm:$0xff]   ;;  %v5046_v52 = vld [vmem:[#allocation8 + $0x168] ss:$16 sps:$4 sm:$0xff]  }
 0x193   :  { %v239_v54 = vrot.slane %v238_v53, 2 }
 0x195   :  { %v240_v55 = vadd.f32 %v239_v54, %v238_v53  ;;  %v5051_v53 = vld [vmem:[#allocation8 + $0x184] ss:$16 sps:$4 sm:$0xff]   ;;  %v5054_v54 = vld [vmem:[#allocation8 + $0x18c] ss:$16 sps:$4 sm:$0xff]  }
 0x197   :  { %v241_v56 = vrot.slane %v240_v55, 1 }
 0x199   :  { %v242_v57 = vadd.f32 %v241_v56, %v240_v55  ;;  %v5049_v55 = vld [vmem:[#allocation8 + $0x180] ss:$16 sps:$4 sm:$0xff]   ;;  %v5052_v56 = vld [vmem:[#allocation8 + $0x188] ss:$16 sps:$4 sm:$0xff]  }
 0x19b   :  { %v243_v58 = vmul.f32 0.125, %v242_v57  ;;  %v5057_v57 = vld [vmem:[#allocation8 + $0x1a4] ss:$16 sps:$4 sm:$0xff]  }
 0x19d   :  { %v244_v59 = vadd.f32 1e-05, %v243_v58  ;;  %v5060_v58 = vld [vmem:[#allocation8 + $0x1ac] ss:$16 sps:$4 sm:$0xff]  }
 0x19f   :  { %5617 = vrsqrt.f32 %v244_v59  ;;  %v5055_v59 = vld [vmem:[#allocation8 + $0x1a0] ss:$16 sps:$4 sm:$0xff]  }
 0x1a9   :  { %v5618_v61 = vpop.eup %5617 }
 0x1aa   :  { %v246_v62 = vmul.f32 %v5618_v61, %v152_v60  ;;  %v5058_v60 = vld [vmem:[#allocation8 + $0x1a8] ss:$16 sps:$4 sm:$0xff]   ;;  %v5061_v61 = vld [vmem:[#allocation8 + $0x1c0] ss:$16 sps:$4 sm:$0xff]  }
 0x1ac   :  { %v247_v0 = vmul.f32 %v246_v62, %v235_v50  ;;  %v5048_v50 = vld [vmem:[#allocation8 + $0x16c] ss:$16 sps:$4 sm:$0xff]   ;;  %v5063_v62 = vld [vmem:[#allocation8 + $0x1c4] ss:$16 sps:$4 sm:$0xff]  }
 0x1ae   :  { %v248_v1 = vadd.f32 %v247_v0, %v153_v63  ;;  %v5064_v63 = vld [vmem:[#allocation8 + $0x1c8] ss:$16 sps:$4 sm:$0xff]   ;;  %v5066_v0 = vld [vmem:[#allocation8 + $0x1cc] ss:$16 sps:$4 sm:$0xff]  }
 0x1b0   :  { %v249_v2 = vmul.f32 0.01, %v248_v1 }
 0x1b2   :  { %v250_v3 = vmax.f32 %v248_v1, %v249_v2  ;;  %v5069_v1 = vld [vmem:[#allocation8 + $0x1e4] ss:$16 sps:$4 sm:$0xff]   ;;  %v5072_v2 = vld [vmem:[#allocation8 + $0x1ec] ss:$16 sps:$4 sm:$0xff]  }
 0x1b4   :  { %v251_v4 = vpack.c.bf16 %v250_v3, %v250_v3  ;;  %v5067_v3 = vld [vmem:[#allocation8 + $0x1e0] ss:$16 sps:$4 sm:$0xff]  }
 0x1b6   :  { %477 = vmatmul.mubr.bf16.vlgmr.msra.gmra.mrb[0].mxu1 %v251_v4  ;;  %518 = vmatmul.mubr.bf16.vlgmr.msra.gmra.mrb[4].mxu0 %v251_v4  ;;  %v5070_v4 = vld [vmem:[#allocation8 + $0x1e8] ss:$16 sps:$4 sm:$0xff]  }
 0x1b7   :  { %1480 = vmatpush1.bf16.msra.mxu1 %v4977_v7  ;;  %1562 = vmatpush1.bf16.msra.mxu0 %v4980_v8 }
 0x1b8   :  { %1481 = vmatprep.subr.bf16.mxu1 %v4985_v9  ;;  %1563 = vmatprep.subr.bf16.mxu0 %v4988_v10 }
 0x1bb   :  { %1482 = vmatpush1.bf16.msra.mxu1 %v4983_v11  ;;  %1564 = vmatpush1.bf16.msra.mxu0 %v4986_v12 }
 0x1bc   :  { %1483 = vmatprep.subr.bf16.mxu1 %v4991_v13  ;;  %1565 = vmatprep.subr.bf16.mxu0 %v4994_v14 }
 0x1bf   :  { %1484 = vmatpush1.bf16.msra.mxu1 %v4989_v15  ;;  %1566 = vmatpush1.bf16.msra.mxu0 %v4992_v16 }
 0x1c0   :  { %1485 = vmatprep.subr.bf16.mxu1 %v4997_v17  ;;  %1567 = vmatprep.subr.bf16.mxu0 %v5000_v18 }
 0x1c3   :  { %1486 = vmatpush1.bf16.msra.mxu1 %v4995_v19  ;;  %1568 = vmatpush1.bf16.msra.mxu0 %v4998_v20 }
 0x1c4   :  { %1487 = vmatprep.subr.bf16.mxu1 %v5003_v21  ;;  %1569 = vmatprep.subr.bf16.mxu0 %v5006_v22 }
 0x1c7   :  { %1488 = vmatpush1.bf16.msra.mxu1 %v5001_v23  ;;  %1570 = vmatpush1.bf16.msra.mxu0 %v5004_v24 }
 0x1c8   :  { %1489 = vmatprep.subr.bf16.mxu1 %v5009_v25  ;;  %1571 = vmatprep.subr.bf16.mxu0 %v5012_v26 }
 0x1cb   :  { %1490 = vmatpush1.bf16.msra.mxu1 %v5007_v27  ;;  %1572 = vmatpush1.bf16.msra.mxu0 %v5010_v28 }
 0x1cc   :  { %1491 = vmatprep.subr.bf16.mxu1 %v5015_v29  ;;  %1573 = vmatprep.subr.bf16.mxu0 %v5018_v30 }
 0x1cf   :  { %1492 = vmatpush1.bf16.msra.mxu1 %v5013_v31  ;;  %1574 = vmatpush1.bf16.msra.mxu0 %v5016_v32 }
 0x1d0   :  { %1493 = vmatprep.subr.bf16.mxu1 %v5021_v33  ;;  %1575 = vmatprep.subr.bf16.mxu0 %v5024_v34 }
 0x1d3   :  { %1494 = vmatpush1.bf16.msra.mxu1 %v5019_v35  ;;  %1576 = vmatpush1.bf16.msra.mxu0 %v5022_v36 }
 0x1d4   :  { %1495 = vmatprep.subr.bf16.mxu1 %v5027_v37  ;;  %1577 = vmatprep.subr.bf16.mxu0 %v5030_v40 }
 0x1d7   :  { %1496 = vmatpush1.bf16.msra.mxu1 %v5025_v38  ;;  %1578 = vmatpush1.bf16.msra.mxu0 %v5028_v39 }
 0x1d8   :  { %1497 = vmatprep.subr.bf16.mxu1 %v5033_v41  ;;  %1579 = vmatprep.subr.bf16.mxu0 %v5036_v42 }
 0x1db   :  { %1498 = vmatpush1.bf16.msra.mxu1 %v5031_v43  ;;  %1580 = vmatpush1.bf16.msra.mxu0 %v5034_v44 }
 0x1dc   :  { %1499 = vmatprep.subr.bf16.mxu1 %v5039_v45  ;;  %1581 = vmatprep.subr.bf16.mxu0 %v5042_v46 }
 0x1df   :  { %1500 = vmatpush1.bf16.msra.mxu1 %v5037_v47  ;;  %1582 = vmatpush1.bf16.msra.mxu0 %v5040_v48 }
 0x1e0   :  { %1501 = vmatprep.subr.bf16.mxu1 %v5045_v49  ;;  %1583 = vmatprep.subr.bf16.mxu0 %v5048_v50 }
 0x1e3   :  { %1502 = vmatpush1.bf16.msra.mxu1 %v5043_v51  ;;  %1584 = vmatpush1.bf16.msra.mxu0 %v5046_v52 }
 0x1e4   :  { %1503 = vmatprep.subr.bf16.mxu1 %v5051_v53  ;;  %1585 = vmatprep.subr.bf16.mxu0 %v5054_v54 }
 0x1e7   :  { %1504 = vmatpush1.bf16.msra.mxu1 %v5049_v55  ;;  %1586 = vmatpush1.bf16.msra.mxu0 %v5052_v56 }
 0x1e8   :  { %1505 = vmatprep.subr.bf16.mxu1 %v5057_v57  ;;  %1587 = vmatprep.subr.bf16.mxu0 %v5060_v58 }
 0x1eb   :  { %1506 = vmatpush1.bf16.msra.mxu1 %v5055_v59  ;;  %1588 = vmatpush1.bf16.msra.mxu0 %v5058_v60 }
 0x1ec   :  { %1507 = vmatprep.subr.bf16.mxu1 %v5063_v62  ;;  %1589 = vmatprep.subr.bf16.mxu0 %v5066_v0 }
 0x1ef   :  { %1508 = vmatpush1.bf16.msra.mxu1 %v5061_v61  ;;  %1590 = vmatpush1.bf16.msra.mxu0 %v5064_v63 }
 0x1f0   :  { %1509 = vmatprep.subr.bf16.mxu1 %v5069_v1  ;;  %1591 = vmatprep.subr.bf16.mxu0 %v5072_v2 }
 0x1f3   :  { %1510 = vmatpush1.bf16.msra.mxu1 %v5067_v3  ;;  %1592 = vmatpush1.bf16.msra.mxu0 %v5070_v4 }
 0x1f4   :  { %1520 = vmatprep.subr.bf16.mxu1 %v5075_v5  ;;  %1602 = vmatprep.subr.bf16.mxu0 %v5078_v6 }
 0x289   :  { %v478_v7 = vpop.f32.mrb[0].mxu1  ;;  %v519_v8 = vpop.f32.mrb[4].mxu0 }
 0x28a   :  { %v526_v9 = vrot.slane %v478_v7, 4  ;;  %v538_v10 = vrot.slane %v519_v8, 4  ;;  %v480_v11 = vpop.f32.mrb[1].mxu1  ;;  %v521_v12 = vpop.f32.mrb[5].mxu0 }
 0x28b   :  { %v532_v13 = vrot.slane %v480_v11, 4  ;;  %v544_v14 = vrot.slane %v521_v12, 4  ;;  %v482_v15 = vpop.f32.mrb[2].mxu1  ;;  %v523_v16 = vpop.f32.mrb[6].mxu0 }
 0x28c   :  { %v527_v17 = vadd.f32 %v526_v9, %v478_v7  ;;  %v539_v18 = vadd.f32 %v538_v10, %v519_v8  ;;  %v483_v19 = vpop.f32.mrb[3].mxu1  ;;  %v524_v20 = vpop.f32.mrb[7].mxu0 }
 0x28d   :  { %v533_v21 = vadd.f32 %v532_v13, %v480_v11  ;;  %v545_v22 = vadd.f32 %v544_v14, %v521_v12  ;;  %v5889_v19 = vmov 1966171168  }
 0x28e   :  { %v528_v23 = vrot.slane %v527_v17, 2  ;;  %v540_v24 = vrot.slane %v539_v18, 2  ;;  %v605_v20 = vunpack.c.l.s4 %v5889_v19  ;;  %v5097_v19 = vld [vmem:[#allocation8 + $0x280] ss:$16 sps:$4 sm:$0xff]  }
 0x28f   :  { %v534_v25 = vrot.slane %v533_v21, 2  ;;  %v546_v26 = vrot.slane %v545_v22, 2 }
 0x290   :  { %v529_v27 = vadd.f32 %v528_v23, %v527_v17  ;;  %v541_v28 = vadd.f32 %v540_v24, %v539_v18 }
 0x291   :  { %v535_v29 = vadd.f32 %v534_v25, %v533_v21  ;;  %v547_v30 = vadd.f32 %v546_v26, %v545_v22  ;;  %v607_v21 = vlaneseq  ;;  %v606_v22 = vunpack.c.0.s8 %v605_v20  ;;  %v5100_v20 = vld [vmem:[#allocation8 + $0x288] ss:$16 sps:$4 sm:$0xff]  }
 0x292   :  { %v530_v31 = vrot.slane %v529_v27, 1  ;;  %v542_v32 = vrot.slane %v541_v28, 1 }
 0x293   :  { %v536_v33 = vrot.slane %v535_v29, 1  ;;  %v548_v34 = vrot.slane %v547_v30, 1  ;;  %v608_v23 = vshrl.u32 %v607_v21, 7 }
 0x294   :  { %v531_v35 = vadd.f32 %v530_v31, %v529_v27  ;;  %v543_v36 = vadd.f32 %v542_v32, %v541_v28 }
 0x295   :  { %v537_v37 = vadd.f32 %v536_v33, %v535_v29  ;;  %v549_v38 = vadd.f32 %v548_v34, %v547_v30  ;;  %v609_v26 = vsub.s32 %v606_v22, %v608_v23  ;;  %v155_v34 = vld [vmem:[#allocation16 + $0x2] ss:$8 sm:$0xf]  ;;  %v5105_v22 = vld [vmem:[#allocation8 + $0x2a4] ss:$16 sps:$4 sm:$0xff]  }
 0x296   :  { %v550_v39 = vmul.f32 0.125, %v531_v35  ;;  %v552_v40 = vmul.f32 0.125, %v543_v36  ;;  %v6087_v35 = vsub.s32 3, %v608_v23 }
 0x297   :  { %v551_v41 = vmul.f32 0.125, %v537_v37  ;;  %v553_v42 = vmul.f32 0.125, %v549_v38  ;;  %v157_v37 = vld [vmem:[#allocation16 + $0x3] ss:$8 sm:$0xf]  ;;  %v6089_v38 = vsub.s32 1, %v608_v23 }
 0x298   :  { %v6070_v43 = vsub.f32 %v478_v7, %v550_v39  ;;  %v6072_v44 = vsub.f32 %v519_v8, %v552_v40  ;;  %v6091_v39 = vsub.s32 0, %v608_v23  ;;  %v6093_v40 = vsub.s32 2, %v608_v23  ;;  %v5108_v23 = vld [vmem:[#allocation8 + $0x2ac] ss:$16 sps:$4 sm:$0xff]  }
 0x299   :  { %v6074_v45 = vsub.f32 %v480_v11, %v551_v41  ;;  %v6076_v46 = vsub.f32 %v521_v12, %v553_v42  ;;  %v661_v42 = vrot.slane %v157_v37, %v6089_v38 }
 0x29a   :  { %v558_v47 = vmul.f32 %v6070_v43, %v6070_v43  ;;  %v560_v48 = vmul.f32 %v6072_v44, %v6072_v44 }
 0x29b   :  { %v559_v49 = vmul.f32 %v6074_v45, %v6074_v45  ;;  %v561_v50 = vmul.f32 %v6076_v46, %v6076_v46 }
 0x29c   :  { %v562_v51 = vrot.slane %v558_v47, 4  ;;  %v574_v52 = vrot.slane %v560_v48, 4 }
 0x29d   :  { %v568_v53 = vrot.slane %v559_v49, 4  ;;  %v580_v54 = vrot.slane %v561_v50, 4 }
 0x29e   :  { %v563_v55 = vadd.f32 %v562_v51, %v558_v47  ;;  %v575_v56 = vadd.f32 %v574_v52, %v560_v48  ;;  %v657_v47 = vrot.slane %v157_v37, %v6091_v39  ;;  %v669_v48 = vrot.slane %v157_v37, %v6087_v35 }
 0x29f   :  { %v569_v57 = vadd.f32 %v568_v53, %v559_v49  ;;  %v581_v58 = vadd.f32 %v580_v54, %v561_v50  ;;  %v665_v49 = vrot.slane %v157_v37, %v6093_v40  ;;  %v5121_v37 = vld [vmem:[#allocation8 + $0x300] ss:$16 sps:$4 sm:$0xff]  }
 0x2a0   :  { %v564_v59 = vrot.slane %v563_v55, 2  ;;  %v576_v60 = vrot.slane %v575_v56, 2 }
 0x2a1   :  { %v570_v61 = vrot.slane %v569_v57, 2  ;;  %v582_v62 = vrot.slane %v581_v58, 2 }
 0x2a2   :  { %v565_v63 = vadd.f32 %v564_v59, %v563_v55  ;;  %v577_v0 = vadd.f32 %v576_v60, %v575_v56 }
 0x2a3   :  { %v571_v1 = vadd.f32 %v570_v61, %v569_v57  ;;  %v583_v2 = vadd.f32 %v582_v62, %v581_v58 }
 0x2a4   :  { %v566_v3 = vrot.slane %v565_v63, 1  ;;  %v578_v4 = vrot.slane %v577_v0, 1 }
 0x2a5   :  { %v572_v5 = vrot.slane %v571_v1, 1  ;;  %v584_v6 = vrot.slane %v583_v2, 1 }
 0x2a6   :  { %v567_v7 = vadd.f32 %v566_v3, %v565_v63  ;;  %v579_v8 = vadd.f32 %v578_v4, %v577_v0 }
 0x2a7   :  { %v573_v9 = vadd.f32 %v572_v5, %v571_v1  ;;  %v585_v10 = vadd.f32 %v584_v6, %v583_v2  ;;  %v5073_v5 = vld [vmem:[#allocation8 + $0x200] ss:$16 sps:$4 sm:$0xff]  }
 0x2a8   :  { %v586_v11 = vmul.f32 0.125, %v567_v7  ;;  %v588_v12 = vmul.f32 0.125, %v579_v8  ;;  %v5079_v7 = vld [vmem:[#allocation8 + $0x220] ss:$16 sps:$4 sm:$0xff]   ;;  %v5082_v8 = vld [vmem:[#allocation8 + $0x228] ss:$16 sps:$4 sm:$0xff]  }
 0x2a9   :  { %v587_v13 = vmul.f32 0.125, %v573_v9  ;;  %v589_v14 = vmul.f32 0.125, %v585_v10  ;;  %v5087_v9 = vld [vmem:[#allocation8 + $0x244] ss:$16 sps:$4 sm:$0xff]   ;;  %v5090_v10 = vld [vmem:[#allocation8 + $0x24c] ss:$16 sps:$4 sm:$0xff]  }
 0x2aa   :  { %v590_v15 = vadd.f32 1e-05, %v586_v11  ;;  %v592_v16 = vadd.f32 1e-05, %v588_v12  ;;  %v5085_v11 = vld [vmem:[#allocation8 + $0x240] ss:$16 sps:$4 sm:$0xff]  }
 0x2ab   :  { %v591_v17 = vadd.f32 1e-05, %v587_v13  ;;  %v593_v18 = vadd.f32 1e-05, %v589_v14  ;;  %v5088_v12 = vld [vmem:[#allocation8 + $0x248] ss:$16 sps:$4 sm:$0xff]  }
 0x2ac   :  { %5619 = vrsqrt.f32 %v590_v15  ;;  %v5093_v13 = vld [vmem:[#allocation8 + $0x264] ss:$16 sps:$4 sm:$0xff]   ;;  %v5096_v14 = vld [vmem:[#allocation8 + $0x26c] ss:$16 sps:$4 sm:$0xff]   ;;  %v5091_v15 = vld [vmem:[#allocation8 + $0x260] ss:$16 sps:$4 sm:$0xff]  }
 0x2ad   :  { %5621 = vrsqrt.f32 %v592_v16  ;;  %v5094_v16 = vld [vmem:[#allocation8 + $0x268] ss:$16 sps:$4 sm:$0xff]  }
 0x2ae   :  { %5623 = vrsqrt.f32 %v591_v17  ;;  %v5099_v17 = vld [vmem:[#allocation8 + $0x284] ss:$16 sps:$4 sm:$0xff]  }
 0x2af   :  { %5625 = vrsqrt.f32 %v593_v18  ;;  %v5102_v18 = vld [vmem:[#allocation8 + $0x28c] ss:$16 sps:$4 sm:$0xff]  }
 0x2b6   :  { %v5620_v24 = vpop.eup %5619 }
 0x2b7   :  { %v5622_v25 = vpop.eup %5621 }
 0x2b8   :  { %v5624_v27 = vpop.eup %5623 }
 0x2b9   :  { %v5626_v28 = vpop.eup %5625  ;;  %v602_v29 = vcombine.low %v5620_v24, %v5624_v27  ;;  %v5103_v24 = vld [vmem:[#allocation8 + $0x2a0] ss:$16 sps:$4 sm:$0xff]   ;;  %v5114_v27 = vld [vmem:[#allocation8 + $0x2cc] ss:$16 sps:$4 sm:$0xff]  }
 0x2ba   :  { %v603_v30 = vcombine.low %v5622_v25, %v5626_v28  ;;  %v5106_v25 = vld [vmem:[#allocation8 + $0x2a8] ss:$16 sps:$4 sm:$0xff]   ;;  %v5109_v28 = vld [vmem:[#allocation8 + $0x2c0] ss:$16 sps:$4 sm:$0xff]  }
 0x2bb   :  { %v610_v31 = vrot.slane %v602_v29, %v609_v26  ;;  %v5112_v29 = vld [vmem:[#allocation8 + $0x2c8] ss:$16 sps:$4 sm:$0xff]  }
 0x2bc   :  { %v617_v32 = vrot.slane %v603_v30, %v609_v26  ;;  %v5117_v30 = vld [vmem:[#allocation8 + $0x2e4] ss:$16 sps:$4 sm:$0xff]  }
 0x2be   :  { %v618_v33 = vcombine.low %v610_v31, %v617_v32  ;;  %v5120_v31 = vld [vmem:[#allocation8 + $0x2ec] ss:$16 sps:$4 sm:$0xff]   ;;  %v5115_v32 = vld [vmem:[#allocation8 + $0x2e0] ss:$16 sps:$4 sm:$0xff]  }
 0x2c0   :  { %v625_v36 = vrot.slane %v618_v33, %v609_v26  ;;  %v5111_v26 = vld [vmem:[#allocation8 + $0x2c4] ss:$16 sps:$4 sm:$0xff]   ;;  %v5118_v33 = vld [vmem:[#allocation8 + $0x2e8] ss:$16 sps:$4 sm:$0xff]  }
 0x2c2   :  { %v627_v41 = vmul.f32 %v625_v36, %v155_v34  ;;  %v5123_v34 = vld [vmem:[#allocation8 + $0x304] ss:$16 sps:$4 sm:$0xff]   ;;  %v5126_v36 = vld [vmem:[#allocation8 + $0x30c] ss:$16 sps:$4 sm:$0xff]  }
 0x2c4   :  { %v644_v50 = vrot.slane %v627_v41, %v6087_v35  ;;  %v636_v51 = vrot.slane %v627_v41, %v6089_v38  ;;  %v632_v52 = vrot.slane %v627_v41, %v6091_v39  ;;  %v640_v53 = vrot.slane %v627_v41, %v6093_v40  ;;  %v5124_v41 = vld [vmem:[#allocation8 + $0x308] ss:$16 sps:$4 sm:$0xff]  }
 0x2c6   :  { %v652_v54 = vmul.f32 %v644_v50, %v6076_v46  ;;  %v650_v55 = vmul.f32 %v636_v51, %v6074_v45  ;;  %v649_v56 = vmul.f32 %v632_v52, %v6070_v43  ;;  %v651_v57 = vmul.f32 %v640_v53, %v6072_v44  ;;  %v5076_v46 = vld [vmem:[#allocation8 + $0x208] ss:$16 sps:$4 sm:$0xff]   ;;  %v5081_v43 = vld [vmem:[#allocation8 + $0x224] ss:$16 sps:$4 sm:$0xff]   ;;  %v5084_v45 = vld [vmem:[#allocation8 + $0x22c] ss:$16 sps:$4 sm:$0xff]  }
 0x2c7   :  { %v5135_v50 = vld [vmem:[#allocation8 + $0x344] ss:$16 sps:$4 sm:$0xff]   ;;  %v5138_v51 = vld [vmem:[#allocation8 + $0x34c] ss:$16 sps:$4 sm:$0xff]   ;;  %v5133_v52 = vld [vmem:[#allocation8 + $0x340] ss:$16 sps:$4 sm:$0xff]  }
 0x2c8   :  { %v675_v58 = vadd.f32 %v661_v42, %v650_v55  ;;  %v674_v59 = vadd.f32 %v657_v47, %v649_v56  ;;  %v677_v60 = vadd.f32 %v669_v48, %v652_v54  ;;  %v6107_v61 = vadd.f32 %v665_v49, %v651_v57  ;;  %v5129_v42 = vld [vmem:[#allocation8 + $0x324] ss:$16 sps:$4 sm:$0xff]   ;;  %v5132_v47 = vld [vmem:[#allocation8 + $0x32c] ss:$16 sps:$4 sm:$0xff]   ;;  %v5127_v48 = vld [vmem:[#allocation8 + $0x320] ss:$16 sps:$4 sm:$0xff]  }
 0x2c9   :  { %v5130_v49 = vld [vmem:[#allocation8 + $0x328] ss:$16 sps:$4 sm:$0xff]   ;;  %v5141_v54 = vld [vmem:[#allocation8 + $0x364] ss:$16 sps:$4 sm:$0xff]   ;;  %v5144_v55 = vld [vmem:[#allocation8 + $0x36c] ss:$16 sps:$4 sm:$0xff]  }
 0x2ca   :  { %v679_v62 = vmul.f32 0.01, %v675_v58  ;;  %v678_v63 = vmul.f32 0.01, %v674_v59  ;;  %v681_v0 = vmul.f32 0.01, %v677_v60 }
 0x2cb   :  { %v5136_v53 = vld [vmem:[#allocation8 + $0x348] ss:$16 sps:$4 sm:$0xff]   ;;  %v5139_v56 = vld [vmem:[#allocation8 + $0x360] ss:$16 sps:$4 sm:$0xff]  }
 0x2cc   :  { %v683_v1 = vmax.f32 %v675_v58, %v679_v62  ;;  %v682_v2 = vmax.f32 %v674_v59, %v678_v63  ;;  %v685_v3 = vmax.f32 %v677_v60, %v681_v0  ;;  %v5142_v57 = vld [vmem:[#allocation8 + $0x368] ss:$16 sps:$4 sm:$0xff]   ;;  %v5147_v58 = vld [vmem:[#allocation8 + $0x384] ss:$16 sps:$4 sm:$0xff]   ;;  %v5150_v59 = vld [vmem:[#allocation8 + $0x38c] ss:$16 sps:$4 sm:$0xff]  }
 0x2cd   :  { %v5145_v60 = vld [vmem:[#allocation8 + $0x380] ss:$16 sps:$4 sm:$0xff]   ;;  %v5148_v62 = vld [vmem:[#allocation8 + $0x388] ss:$16 sps:$4 sm:$0xff]   ;;  %v5153_v63 = vld [vmem:[#allocation8 + $0x3a4] ss:$16 sps:$4 sm:$0xff]  }
 0x2ce   :  { %v687_v4 = vpack.c.bf16 %v683_v1, %v683_v1  ;;  %v686_v6 = vpack.c.bf16 %v682_v2, %v682_v2  ;;  %v689_v44 = vpack.c.bf16 %v685_v3, %v685_v3  ;;  %v5156_v0 = vld [vmem:[#allocation8 + $0x3ac] ss:$16 sps:$4 sm:$0xff]   ;;  %v5151_v1 = vld [vmem:[#allocation8 + $0x3a0] ss:$16 sps:$4 sm:$0xff]   ;;  %v5154_v2 = vld [vmem:[#allocation8 + $0x3a8] ss:$16 sps:$4 sm:$0xff]  }
 0x2cf   :  { %v5159_v3 = vld [vmem:[#allocation8 + $0x3c4] ss:$16 sps:$4 sm:$0xff]  }
 0x2d0   :  { %1511 = vmatprep.mubr.bf16.mxu1 %v687_v4  ;;  %1593 = vmatprep.mubr.bf16.mxu0 %v687_v4  ;;  %v5162_v4 = vld [vmem:[#allocation8 + $0x3cc] ss:$16 sps:$4 sm:$0xff]  }
 0x2d1   :  { %1512 = vmatmul.mubr.bf16.vlgmr.msra.gmra.mrb[4].mxu1 %v686_v6  ;;  %1594 = vmatmul.mubr.bf16.vlgmr.msra.gmra.mrb[8].mxu0 %v686_v6  ;;  %v5165_v6 = vld [vmem:[#allocation8 + $0x3e4] ss:$16 sps:$4 sm:$0xff]  }
 0x2d2   :  { %1521 = vmatpush1.bf16.msra.mxu1 %v5073_v5  ;;  %1603 = vmatpush1.bf16.msra.mxu0 %v5076_v46  ;;  %v5157_v5 = vld [vmem:[#allocation8 + $0x3c0] ss:$16 sps:$4 sm:$0xff]   ;;  %v5160_v46 = vld [vmem:[#allocation8 + $0x3c8] ss:$16 sps:$4 sm:$0xff]  }
 0x2d3   :  { %1552 = vmatprep.mubr.bf16.mxu1 %v689_v44  ;;  %1634 = vmatprep.mubr.bf16.mxu0 %v689_v44  ;;  %v5163_v44 = vld [vmem:[#allocation8 + $0x3e0] ss:$16 sps:$4 sm:$0xff]  }
 0x2d4   :  { %1522 = vmatprep.subr.bf16.mxu1 %v5081_v43  ;;  %1604 = vmatprep.subr.bf16.mxu0 %v5084_v45  ;;  %v5168_v43 = vld [vmem:[#allocation8 + $0x3ec] ss:$16 sps:$4 sm:$0xff]   ;;  %v680_v45 = vmul.f32 0.01, %v6107_v61 }
 0x2d6   :  { %1523 = vmatpush1.bf16.msra.mxu1 %v5079_v7  ;;  %1605 = vmatpush1.bf16.msra.mxu0 %v5082_v8  ;;  %v5166_v7 = vld [vmem:[#allocation8 + $0x3e8] ss:$16 sps:$4 sm:$0xff]   ;;  %v684_v8 = vmax.f32 %v6107_v61, %v680_v45  ;;  %v5183_v61 = vld [vmem:[#allocation10 + $0x44] ss:$16 sps:$4 sm:$0xff]   ;;  %v5247_v45 = vld [vmem:[#allocation10 + $0x1a0] ss:$16 sps:$4 sm:$0xff]  }
 0x2d7   :  { %1524 = vmatprep.subr.bf16.mxu1 %v5087_v9  ;;  %1606 = vmatprep.subr.bf16.mxu0 %v5090_v10  ;;  %v5171_v9 = vld [vmem:[#allocation10 + $0x4] ss:$16 sps:$4 sm:$0xff]   ;;  %v5174_v10 = vld [vmem:[#allocation10 + $0xc] ss:$16 sps:$4 sm:$0xff]  }
 0x2da   :  { %1525 = vmatpush1.bf16.msra.mxu1 %v5085_v11  ;;  %1607 = vmatpush1.bf16.msra.mxu0 %v5088_v12  ;;  %v5169_v11 = vld [vmem:[#allocation10] ss:$16 sps:$4 sm:$0xff]   ;;  %v5172_v12 = vld [vmem:[#allocation10 + $0x8] ss:$16 sps:$4 sm:$0xff]  }
 0x2db   :  { %1526 = vmatprep.subr.bf16.mxu1 %v5093_v13  ;;  %1608 = vmatprep.subr.bf16.mxu0 %v5096_v14  ;;  %v688_v13 = vpack.c.bf16 %v684_v8, %v684_v8  ;;  %v5177_v14 = vld [vmem:[#allocation10 + $0x24] ss:$16 sps:$4 sm:$0xff]   ;;  %v5258_v8 = vld [vmem:[#allocation10 + $0x1cc] ss:$16 sps:$4 sm:$0xff]  }
 0x2de   :  { %1527 = vmatpush1.bf16.msra.mxu1 %v5091_v15  ;;  %1609 = vmatpush1.bf16.msra.mxu0 %v5094_v16  ;;  %v5180_v15 = vld [vmem:[#allocation10 + $0x2c] ss:$16 sps:$4 sm:$0xff]   ;;  %v5175_v16 = vld [vmem:[#allocation10 + $0x20] ss:$16 sps:$4 sm:$0xff]  }
 0x2df   :  { %1528 = vmatprep.subr.bf16.mxu1 %v5099_v17  ;;  %1610 = vmatprep.subr.bf16.mxu0 %v5102_v18  ;;  %v5178_v17 = vld [vmem:[#allocation10 + $0x28] ss:$16 sps:$4 sm:$0xff]   ;;  %v5186_v18 = vld [vmem:[#allocation10 + $0x4c] ss:$16 sps:$4 sm:$0xff]  }
 0x2e2   :  { %1529 = vmatpush1.bf16.msra.mxu1 %v5097_v19  ;;  %1611 = vmatpush1.bf16.msra.mxu0 %v5100_v20  ;;  %v5181_v19 = vld [vmem:[#allocation10 + $0x40] ss:$16 sps:$4 sm:$0xff]   ;;  %v5184_v20 = vld [vmem:[#allocation10 + $0x48] ss:$16 sps:$4 sm:$0xff]  }
 0x2e3   :  { %1530 = vmatprep.subr.bf16.mxu1 %v5105_v22  ;;  %1612 = vmatprep.subr.bf16.mxu0 %v5108_v23  ;;  %v5189_v22 = vld [vmem:[#allocation10 + $0x64] ss:$16 sps:$4 sm:$0xff]   ;;  %v5192_v23 = vld [vmem:[#allocation10 + $0x6c] ss:$16 sps:$4 sm:$0xff]  }
 0x2e6   :  { %1531 = vmatpush1.bf16.msra.mxu1 %v5103_v24  ;;  %1613 = vmatpush1.bf16.msra.mxu0 %v5106_v25  ;;  %v5187_v24 = vld [vmem:[#allocation10 + $0x60] ss:$16 sps:$4 sm:$0xff]   ;;  %v5190_v25 = vld [vmem:[#allocation10 + $0x68] ss:$16 sps:$4 sm:$0xff]  }
 0x2e7   :  { %1532 = vmatprep.subr.bf16.mxu1 %v5111_v26  ;;  %1614 = vmatprep.subr.bf16.mxu0 %v5114_v27  ;;  %v5195_v26 = vld [vmem:[#allocation10 + $0x84] ss:$16 sps:$4 sm:$0xff]   ;;  %v5198_v27 = vld [vmem:[#allocation10 + $0x8c] ss:$16 sps:$4 sm:$0xff]  }
 0x2ea   :  { %1533 = vmatpush1.bf16.msra.mxu1 %v5109_v28  ;;  %1615 = vmatpush1.bf16.msra.mxu0 %v5112_v29  ;;  %v5193_v28 = vld [vmem:[#allocation10 + $0x80] ss:$16 sps:$4 sm:$0xff]   ;;  %v5196_v29 = vld [vmem:[#allocation10 + $0x88] ss:$16 sps:$4 sm:$0xff]  }
 0x2eb   :  { %1534 = vmatprep.subr.bf16.mxu1 %v5117_v30  ;;  %1616 = vmatprep.subr.bf16.mxu0 %v5120_v31  ;;  %v5201_v30 = vld [vmem:[#allocation10 + $0xa4] ss:$16 sps:$4 sm:$0xff]   ;;  %v5204_v31 = vld [vmem:[#allocation10 + $0xac] ss:$16 sps:$4 sm:$0xff]  }
 0x2ee   :  { %1535 = vmatpush1.bf16.msra.mxu1 %v5115_v32  ;;  %1617 = vmatpush1.bf16.msra.mxu0 %v5118_v33  ;;  %v5199_v32 = vld [vmem:[#allocation10 + $0xa0] ss:$16 sps:$4 sm:$0xff]   ;;  %v5202_v33 = vld [vmem:[#allocation10 + $0xa8] ss:$16 sps:$4 sm:$0xff]  }
 0x2ef   :  { %1536 = vmatprep.subr.bf16.mxu1 %v5123_v34  ;;  %1618 = vmatprep.subr.bf16.mxu0 %v5126_v36  ;;  %v5207_v34 = vld [vmem:[#allocation10 + $0xc4] ss:$16 sps:$4 sm:$0xff]   ;;  %v5210_v36 = vld [vmem:[#allocation10 + $0xcc] ss:$16 sps:$4 sm:$0xff]  }
 0x2f2   :  { %1537 = vmatpush1.bf16.msra.mxu1 %v5121_v37  ;;  %1619 = vmatpush1.bf16.msra.mxu0 %v5124_v41  ;;  %v5205_v37 = vld [vmem:[#allocation10 + $0xc0] ss:$16 sps:$4 sm:$0xff]   ;;  %v5208_v41 = vld [vmem:[#allocation10 + $0xc8] ss:$16 sps:$4 sm:$0xff]  }
 0x2f3   :  { %1538 = vmatprep.subr.bf16.mxu1 %v5129_v42  ;;  %1620 = vmatprep.subr.bf16.mxu0 %v5132_v47  ;;  %v5213_v42 = vld [vmem:[#allocation10 + $0xe4] ss:$16 sps:$4 sm:$0xff]   ;;  %v5216_v47 = vld [vmem:[#allocation10 + $0xec] ss:$16 sps:$4 sm:$0xff]  }
 0x2f6   :  { %1539 = vmatpush1.bf16.msra.mxu1 %v5127_v48  ;;  %1621 = vmatpush1.bf16.msra.mxu0 %v5130_v49  ;;  %v5211_v48 = vld [vmem:[#allocation10 + $0xe0] ss:$16 sps:$4 sm:$0xff]   ;;  %v5214_v49 = vld [vmem:[#allocation10 + $0xe8] ss:$16 sps:$4 sm:$0xff]  }
 0x2f7   :  { %1540 = vmatprep.subr.bf16.mxu1 %v5135_v50  ;;  %1622 = vmatprep.subr.bf16.mxu0 %v5138_v51  ;;  %v5219_v50 = vld [vmem:[#allocation10 + $0x104] ss:$16 sps:$4 sm:$0xff]   ;;  %v5222_v51 = vld [vmem:[#allocation10 + $0x10c] ss:$16 sps:$4 sm:$0xff]  }
 0x2fa   :  { %1541 = vmatpush1.bf16.msra.mxu1 %v5133_v52  ;;  %1623 = vmatpush1.bf16.msra.mxu0 %v5136_v53  ;;  %v5217_v52 = vld [vmem:[#allocation10 + $0x100] ss:$16 sps:$4 sm:$0xff]   ;;  %v5220_v53 = vld [vmem:[#allocation10 + $0x108] ss:$16 sps:$4 sm:$0xff]  }
 0x2fb   :  { %1542 = vmatprep.subr.bf16.mxu1 %v5141_v54  ;;  %1624 = vmatprep.subr.bf16.mxu0 %v5144_v55  ;;  %v5225_v54 = vld [vmem:[#allocation10 + $0x124] ss:$16 sps:$4 sm:$0xff]   ;;  %v5228_v55 = vld [vmem:[#allocation10 + $0x12c] ss:$16 sps:$4 sm:$0xff]  }
 0x2fe   :  { %1543 = vmatpush1.bf16.msra.mxu1 %v5139_v56  ;;  %1625 = vmatpush1.bf16.msra.mxu0 %v5142_v57  ;;  %v5223_v56 = vld [vmem:[#allocation10 + $0x120] ss:$16 sps:$4 sm:$0xff]   ;;  %v5226_v57 = vld [vmem:[#allocation10 + $0x128] ss:$16 sps:$4 sm:$0xff]  }
 0x2ff   :  { %1544 = vmatprep.subr.bf16.mxu1 %v5147_v58  ;;  %1626 = vmatprep.subr.bf16.mxu0 %v5150_v59  ;;  %v5231_v58 = vld [vmem:[#allocation10 + $0x144] ss:$16 sps:$4 sm:$0xff]   ;;  %v5234_v59 = vld [vmem:[#allocation10 + $0x14c] ss:$16 sps:$4 sm:$0xff]  }
 0x302   :  { %1545 = vmatpush1.bf16.msra.mxu1 %v5145_v60  ;;  %1627 = vmatpush1.bf16.msra.mxu0 %v5148_v62  ;;  %v5229_v60 = vld [vmem:[#allocation10 + $0x140] ss:$16 sps:$4 sm:$0xff]   ;;  %v5232_v62 = vld [vmem:[#allocation10 + $0x148] ss:$16 sps:$4 sm:$0xff]  }
 0x303   :  { %1546 = vmatprep.subr.bf16.mxu1 %v5153_v63  ;;  %1628 = vmatprep.subr.bf16.mxu0 %v5156_v0  ;;  %v5237_v63 = vld [vmem:[#allocation10 + $0x164] ss:$16 sps:$4 sm:$0xff]   ;;  %v5240_v0 = vld [vmem:[#allocation10 + $0x16c] ss:$16 sps:$4 sm:$0xff]  }
 0x306   :  { %1547 = vmatpush1.bf16.msra.mxu1 %v5151_v1  ;;  %1629 = vmatpush1.bf16.msra.mxu0 %v5154_v2  ;;  %v5235_v1 = vld [vmem:[#allocation10 + $0x160] ss:$16 sps:$4 sm:$0xff]   ;;  %v5238_v2 = vld [vmem:[#allocation10 + $0x168] ss:$16 sps:$4 sm:$0xff]  }
 0x307   :  { %1548 = vmatprep.subr.bf16.mxu1 %v5159_v3  ;;  %1630 = vmatprep.subr.bf16.mxu0 %v5162_v4  ;;  %v5243_v3 = vld [vmem:[#allocation10 + $0x184] ss:$16 sps:$4 sm:$0xff]   ;;  %v5246_v4 = vld [vmem:[#allocation10 + $0x18c] ss:$16 sps:$4 sm:$0xff]  }
 0x30a   :  { %1549 = vmatpush1.bf16.msra.mxu1 %v5157_v5  ;;  %1631 = vmatpush1.bf16.msra.mxu0 %v5160_v46  ;;  %v5241_v5 = vld [vmem:[#allocation10 + $0x180] ss:$16 sps:$4 sm:$0xff]   ;;  %v5244_v46 = vld [vmem:[#allocation10 + $0x188] ss:$16 sps:$4 sm:$0xff]  }
 0x30b   :  { %1550 = vmatprep.subr.bf16.mxu1 %v5165_v6  ;;  %1632 = vmatprep.subr.bf16.mxu0 %v5168_v43  ;;  %v5249_v6 = vld [vmem:[#allocation10 + $0x1a4] ss:$16 sps:$4 sm:$0xff]   ;;  %v5252_v43 = vld [vmem:[#allocation10 + $0x1ac] ss:$16 sps:$4 sm:$0xff]  }
 0x30e   :  { %1551 = vmatpush1.bf16.msra.mxu1 %v5163_v44  ;;  %1633 = vmatpush1.bf16.msra.mxu0 %v5166_v7  ;;  %v5250_v44 = vld [vmem:[#allocation10 + $0x1a8] ss:$16 sps:$4 sm:$0xff]   ;;  %v5255_v7 = vld [vmem:[#allocation10 + $0x1c4] ss:$16 sps:$4 sm:$0xff]  }
 0x30f   :  { %2444 = vmatprep.subr.bf16.mxu1 %v5171_v9  ;;  %2526 = vmatprep.subr.bf16.mxu0 %v5174_v10  ;;  %v5253_v9 = vld [vmem:[#allocation10 + $0x1c0] ss:$16 sps:$4 sm:$0xff]   ;;  %v5256_v10 = vld [vmem:[#allocation10 + $0x1c8] ss:$16 sps:$4 sm:$0xff]  }
 0x311   :  { %1553 = vmatmul.mubr.bf16.vlgmr.msra.gmra.mrb[4].mxu1 %v688_v13  ;;  %1635 = vmatmul.mubr.bf16.vlgmr.msra.gmra.mrb[8].mxu0 %v688_v13  ;;  %v5259_v13 = vld [vmem:[#allocation10 + $0x1e0] ss:$16 sps:$4 sm:$0xff]  }
 0x312   :  { %2445 = vmatpush1.bf16.msra.mxu1 %v5169_v11  ;;  %2527 = vmatpush1.bf16.msra.mxu0 %v5172_v12  ;;  %v5261_v11 = vld [vmem:[#allocation10 + $0x1e4] ss:$16 sps:$4 sm:$0xff]   ;;  %v5264_v12 = vld [vmem:[#allocation10 + $0x1ec] ss:$16 sps:$4 sm:$0xff]  }
 0x313   :  { %2446 = vmatprep.subr.bf16.mxu1 %v5177_v14  ;;  %2528 = vmatprep.subr.bf16.mxu0 %v5180_v15  ;;  %v5262_v14 = vld [vmem:[#allocation10 + $0x1e8] ss:$16 sps:$4 sm:$0xff]   ;;  %v5267_v15 = vld [vmem:[#allocation10 + $0x204] ss:$16 sps:$4 sm:$0xff]  }
 0x316   :  { %2447 = vmatpush1.bf16.msra.mxu1 %v5175_v16  ;;  %2529 = vmatpush1.bf16.msra.mxu0 %v5178_v17  ;;  %v5270_v16 = vld [vmem:[#allocation10 + $0x20c] ss:$16 sps:$4 sm:$0xff]  }
 0x317   :  { %2448 = vmatprep.subr.bf16.mxu1 %v5183_v61  ;;  %2530 = vmatprep.subr.bf16.mxu0 %v5186_v18  ;;  %v6111_v17 = vld [vmem:[#allocation16 + $0x4] ss:$8 sm:$0xf] }
 0x318   :  { %v822_v61 = vrot.slane %v6111_v17, %v6091_v39  ;;  %v826_v18 = vrot.slane %v6111_v17, %v6089_v38 }
 0x31a   :  { %2449 = vmatpush1.bf16.msra.mxu1 %v5181_v19  ;;  %2531 = vmatpush1.bf16.msra.mxu0 %v5184_v20  ;;  %v834_v19 = vrot.slane %v6111_v17, %v6087_v35 }
 0x31b   :  { %2450 = vmatprep.subr.bf16.mxu1 %v5189_v22  ;;  %2532 = vmatprep.subr.bf16.mxu0 %v5192_v23 }
 0x31e   :  { %2451 = vmatpush1.bf16.msra.mxu1 %v5187_v24  ;;  %2533 = vmatpush1.bf16.msra.mxu0 %v5190_v25 }
 0x31f   :  { %2452 = vmatprep.subr.bf16.mxu1 %v5195_v26  ;;  %2534 = vmatprep.subr.bf16.mxu0 %v5198_v27 }
 0x322   :  { %2453 = vmatpush1.bf16.msra.mxu1 %v5193_v28  ;;  %2535 = vmatpush1.bf16.msra.mxu0 %v5196_v29 }
 0x323   :  { %2454 = vmatprep.subr.bf16.mxu1 %v5201_v30  ;;  %2536 = vmatprep.subr.bf16.mxu0 %v5204_v31 }
 0x326   :  { %2455 = vmatpush1.bf16.msra.mxu1 %v5199_v32  ;;  %2537 = vmatpush1.bf16.msra.mxu0 %v5202_v33 }
 0x327   :  { %2456 = vmatprep.subr.bf16.mxu1 %v5207_v34  ;;  %2538 = vmatprep.subr.bf16.mxu0 %v5210_v36 }
 0x32a   :  { %2457 = vmatpush1.bf16.msra.mxu1 %v5205_v37  ;;  %2539 = vmatpush1.bf16.msra.mxu0 %v5208_v41 }
 0x32b   :  { %2458 = vmatprep.subr.bf16.mxu1 %v5213_v42  ;;  %2540 = vmatprep.subr.bf16.mxu0 %v5216_v47  ;;  %v5265_v47 = vld [vmem:[#allocation10 + $0x200] ss:$16 sps:$4 sm:$0xff]  }
 0x32e   :  { %2459 = vmatpush1.bf16.msra.mxu1 %v5211_v48  ;;  %2541 = vmatpush1.bf16.msra.mxu0 %v5214_v49  ;;  %v5268_v48 = vld [vmem:[#allocation10 + $0x208] ss:$16 sps:$4 sm:$0xff]  }
 0x32f   :  { %2460 = vmatprep.subr.bf16.mxu1 %v5219_v50  ;;  %2542 = vmatprep.subr.bf16.mxu0 %v5222_v51  ;;  %v5273_v50 = vld [vmem:[#allocation10 + $0x224] ss:$16 sps:$4 sm:$0xff]   ;;  %v5276_v51 = vld [vmem:[#allocation10 + $0x22c] ss:$16 sps:$4 sm:$0xff]  }
 0x332   :  { %2461 = vmatpush1.bf16.msra.mxu1 %v5217_v52  ;;  %2543 = vmatpush1.bf16.msra.mxu0 %v5220_v53  ;;  %v5271_v53 = vld [vmem:[#allocation10 + $0x220] ss:$16 sps:$4 sm:$0xff]  }
 0x333   :  { %2462 = vmatprep.subr.bf16.mxu1 %v5225_v54  ;;  %2544 = vmatprep.subr.bf16.mxu0 %v5228_v55  ;;  %v5274_v54 = vld [vmem:[#allocation10 + $0x228] ss:$16 sps:$4 sm:$0xff]   ;;  %v5279_v55 = vld [vmem:[#allocation10 + $0x244] ss:$16 sps:$4 sm:$0xff]  }
 0x336   :  { %2463 = vmatpush1.bf16.msra.mxu1 %v5223_v56  ;;  %2545 = vmatpush1.bf16.msra.mxu0 %v5226_v57  ;;  %v5282_v56 = vld [vmem:[#allocation10 + $0x24c] ss:$16 sps:$4 sm:$0xff]   ;;  %v5277_v57 = vld [vmem:[#allocation10 + $0x240] ss:$16 sps:$4 sm:$0xff]  }
 0x337   :  { %2464 = vmatprep.subr.bf16.mxu1 %v5231_v58  ;;  %2546 = vmatprep.subr.bf16.mxu0 %v5234_v59  ;;  %v5280_v58 = vld [vmem:[#allocation10 + $0x248] ss:$16 sps:$4 sm:$0xff]   ;;  %v5285_v59 = vld [vmem:[#allocation10 + $0x264] ss:$16 sps:$4 sm:$0xff]  }
 0x33a   :  { %2465 = vmatpush1.bf16.msra.mxu1 %v5229_v60  ;;  %2547 = vmatpush1.bf16.msra.mxu0 %v5232_v62  ;;  %v5288_v60 = vld [vmem:[#allocation10 + $0x26c] ss:$16 sps:$4 sm:$0xff]   ;;  %v5283_v62 = vld [vmem:[#allocation10 + $0x260] ss:$16 sps:$4 sm:$0xff]  }
 0x33b   :  { %2466 = vmatprep.subr.bf16.mxu1 %v5237_v63  ;;  %2548 = vmatprep.subr.bf16.mxu0 %v5240_v0  ;;  %v5286_v63 = vld [vmem:[#allocation10 + $0x268] ss:$16 sps:$4 sm:$0xff]   ;;  %v5291_v0 = vld [vmem:[#allocation10 + $0x284] ss:$16 sps:$4 sm:$0xff]  }
 0x33e   :  { %2467 = vmatpush1.bf16.msra.mxu1 %v5235_v1  ;;  %2549 = vmatpush1.bf16.msra.mxu0 %v5238_v2  ;;  %v5294_v1 = vld [vmem:[#allocation10 + $0x28c] ss:$16 sps:$4 sm:$0xff]   ;;  %v5289_v2 = vld [vmem:[#allocation10 + $0x280] ss:$16 sps:$4 sm:$0xff]  }
 0x33f   :  { %2468 = vmatprep.subr.bf16.mxu1 %v5243_v3  ;;  %2550 = vmatprep.subr.bf16.mxu0 %v5246_v4  ;;  %v5292_v3 = vld [vmem:[#allocation10 + $0x288] ss:$16 sps:$4 sm:$0xff]   ;;  %v5297_v4 = vld [vmem:[#allocation10 + $0x2a4] ss:$16 sps:$4 sm:$0xff]  }
 0x342   :  { %2469 = vmatpush1.bf16.msra.mxu1 %v5241_v5  ;;  %2551 = vmatpush1.bf16.msra.mxu0 %v5244_v46  ;;  %v5300_v5 = vld [vmem:[#allocation10 + $0x2ac] ss:$16 sps:$4 sm:$0xff]   ;;  %v5295_v46 = vld [vmem:[#allocation10 + $0x2a0] ss:$16 sps:$4 sm:$0xff]  }
 0x343   :  { %2470 = vmatprep.subr.bf16.mxu1 %v5249_v6  ;;  %2552 = vmatprep.subr.bf16.mxu0 %v5252_v43  ;;  %v5298_v6 = vld [vmem:[#allocation10 + $0x2a8] ss:$16 sps:$4 sm:$0xff]   ;;  %v5303_v43 = vld [vmem:[#allocation10 + $0x2c4] ss:$16 sps:$4 sm:$0xff]  }
 0x346   :  { %2471 = vmatpush1.bf16.msra.mxu1 %v5247_v45  ;;  %2553 = vmatpush1.bf16.msra.mxu0 %v5250_v44  ;;  %v5306_v45 = vld [vmem:[#allocation10 + $0x2cc] ss:$16 sps:$4 sm:$0xff]   ;;  %v5301_v44 = vld [vmem:[#allocation10 + $0x2c0] ss:$16 sps:$4 sm:$0xff]  }
 0x347   :  { %2472 = vmatprep.subr.bf16.mxu1 %v5255_v7  ;;  %2554 = vmatprep.subr.bf16.mxu0 %v5258_v8  ;;  %v5304_v7 = vld [vmem:[#allocation10 + $0x2c8] ss:$16 sps:$4 sm:$0xff]   ;;  %v5309_v8 = vld [vmem:[#allocation10 + $0x2e4] ss:$16 sps:$4 sm:$0xff]  }
 0x34a   :  { %2473 = vmatpush1.bf16.msra.mxu1 %v5253_v9  ;;  %2555 = vmatpush1.bf16.msra.mxu0 %v5256_v10  ;;  %v5312_v9 = vld [vmem:[#allocation10 + $0x2ec] ss:$16 sps:$4 sm:$0xff]   ;;  %v5307_v10 = vld [vmem:[#allocation10 + $0x2e0] ss:$16 sps:$4 sm:$0xff]  }
 0x34b   :  { %2474 = vmatprep.subr.bf16.mxu1 %v5261_v11  ;;  %2556 = vmatprep.subr.bf16.mxu0 %v5264_v12  ;;  %v5310_v11 = vld [vmem:[#allocation10 + $0x2e8] ss:$16 sps:$4 sm:$0xff]   ;;  %v5315_v12 = vld [vmem:[#allocation10 + $0x304] ss:$16 sps:$4 sm:$0xff]  }
 0x34e   :  { %2475 = vmatpush1.bf16.msra.mxu1 %v5259_v13  ;;  %2557 = vmatpush1.bf16.msra.mxu0 %v5262_v14  ;;  %v5318_v13 = vld [vmem:[#allocation10 + $0x30c] ss:$16 sps:$4 sm:$0xff]   ;;  %v5313_v14 = vld [vmem:[#allocation10 + $0x300] ss:$16 sps:$4 sm:$0xff]  }
 0x34f   :  { %2485 = vmatprep.subr.bf16.mxu1 %v5267_v15  ;;  %2567 = vmatprep.subr.bf16.mxu0 %v5270_v16  ;;  %v5316_v15 = vld [vmem:[#allocation10 + $0x308] ss:$16 sps:$4 sm:$0xff]   ;;  %v5321_v16 = vld [vmem:[#allocation10 + $0x324] ss:$16 sps:$4 sm:$0xff]  }
 0x3e4   :  { %v1554_v20 = vpop.f32.mrb[4].mxu1  ;;  %v6119_v22 = vpop.f32.mrb[8].mxu0 }
 0x3e5   :  { %v4873_v23 = vadd.f32 %v1554_v20, %v822_v61  ;;  %v1556_v24 = vpop.f32.mrb[5].mxu1  ;;  %v1638_v25 = vpop.f32.mrb[9].mxu0  ;;  %v5324_v61 = vld [vmem:[#allocation10 + $0x32c] ss:$16 sps:$4 sm:$0xff]   ;;  %v5327_v20 = vld [vmem:[#allocation10 + $0x344] ss:$16 sps:$4 sm:$0xff]  }
 0x3e6   :  { %v4874_v26 = vadd.f32 %v1556_v24, %v826_v18  ;;  %v4876_v27 = vadd.f32 %v1638_v25, %v834_v19  ;;  %v1558_v28 = vpop.f32.mrb[6].mxu1  ;;  %v1640_v29 = vpop.f32.mrb[10].mxu0  ;;  %v5319_v18 = vld [vmem:[#allocation10 + $0x320] ss:$16 sps:$4 sm:$0xff]   ;;  %v5322_v19 = vld [vmem:[#allocation10 + $0x328] ss:$16 sps:$4 sm:$0xff]  }
 0x3e7   :  { %v1643_v30 = vmul.f32 0.01, %v4873_v23  ;;  %v1559_v31 = vpop.f32.mrb[7].mxu1  ;;  %v1641_v32 = vpop.f32.mrb[11].mxu0  ;;  %v5325_v24 = vld [vmem:[#allocation10 + $0x340] ss:$16 sps:$4 sm:$0xff]  }
 0x3e8   :  { %v1644_v33 = vmul.f32 0.01, %v4874_v26  ;;  %v1646_v34 = vmul.f32 0.01, %v4876_v27  ;;  %v5328_v25 = vld [vmem:[#allocation10 + $0x348] ss:$16 sps:$4 sm:$0xff]  }
 0x3e9   :  { %v1647_v36 = vmax.f32 %v4873_v23, %v1643_v30  ;;  %v5330_v23 = vld [vmem:[#allocation10 + $0x34c] ss:$16 sps:$4 sm:$0xff]   ;;  %v5331_v28 = vld [vmem:[#allocation10 + $0x360] ss:$16 sps:$4 sm:$0xff]   ;;  %v5334_v29 = vld [vmem:[#allocation10 + $0x368] ss:$16 sps:$4 sm:$0xff]  }
 0x3ea   :  { %v1648_v37 = vmax.f32 %v4874_v26, %v1644_v33  ;;  %v1650_v41 = vmax.f32 %v4876_v27, %v1646_v34  ;;  %v5333_v26 = vld [vmem:[#allocation10 + $0x364] ss:$16 sps:$4 sm:$0xff]   ;;  %v5336_v27 = vld [vmem:[#allocation10 + $0x36c] ss:$16 sps:$4 sm:$0xff]   ;;  %v5337_v32 = vld [vmem:[#allocation10 + $0x380] ss:$16 sps:$4 sm:$0xff]   ;;  %v830_v34 = vrot.slane %v6111_v17, %v6093_v40 }
 0x3eb   :  { %v6123_v49 = vpack.c.bf16 %v1647_v36, %v1647_v36  ;;  %v5339_v30 = vld [vmem:[#allocation10 + $0x384] ss:$16 sps:$4 sm:$0xff]   ;;  %v5342_v31 = vld [vmem:[#allocation10 + $0x38c] ss:$16 sps:$4 sm:$0xff]   ;;  %v5340_v33 = vld [vmem:[#allocation10 + $0x388] ss:$16 sps:$4 sm:$0xff]  }
 0x3ec   :  { %v6121_v42 = vpack.c.bf16 %v1648_v37, %v1648_v37  ;;  %v6127_v52 = vpack.c.bf16 %v1650_v41, %v1650_v41  ;;  %v5345_v36 = vld [vmem:[#allocation10 + $0x3a4] ss:$16 sps:$4 sm:$0xff]   ;;  %v5348_v37 = vld [vmem:[#allocation10 + $0x3ac] ss:$16 sps:$4 sm:$0xff]   ;;  %v5343_v41 = vld [vmem:[#allocation10 + $0x3a0] ss:$16 sps:$4 sm:$0xff]  }
 0x3ed   :  { %v5357_v17 = vld [vmem:[#allocation10 + $0x3e4] ss:$16 sps:$4 sm:$0xff]  }
 0x3ee   :  { %2476 = vmatprep.mubr.bf16.mxu1 %v6121_v42  ;;  %2558 = vmatprep.mubr.bf16.mxu0 %v6121_v42 }
 0x3ef   :  { %2477 = vmatmul.mubr.bf16.vlgmr.msra.gmra.mrb[8].mxu1 %v6123_v49  ;;  %2559 = vmatmul.mubr.bf16.vlgmr.msra.gmra.mrb[12].mxu0 %v6123_v49 }
 0x3f0   :  { %2486 = vmatpush1.bf16.msra.mxu1 %v5265_v47  ;;  %2568 = vmatpush1.bf16.msra.mxu0 %v5268_v48  ;;  %v5346_v47 = vld [vmem:[#allocation10 + $0x3a8] ss:$16 sps:$4 sm:$0xff]   ;;  %v4875_v48 = vadd.f32 %v6119_v22, %v830_v34  ;;  %v5363_v22 = vld [vmem:[#allocation11 + $0x4] ss:$16 sps:$4 sm:$0xff]  }
 0x3f1   :  { %2517 = vmatprep.mubr.bf16.mxu1 %v6127_v52  ;;  %2599 = vmatprep.mubr.bf16.mxu0 %v6127_v52  ;;  %v5423_v34 = vld [vmem:[#allocation11 + $0x144] ss:$16 sps:$4 sm:$0xff]  }
 0x3f2   :  { %2487 = vmatprep.subr.bf16.mxu1 %v5273_v50  ;;  %2569 = vmatprep.subr.bf16.mxu0 %v5276_v51  ;;  %v5351_v50 = vld [vmem:[#allocation10 + $0x3c4] ss:$16 sps:$4 sm:$0xff]   ;;  %v5354_v51 = vld [vmem:[#allocation10 + $0x3cc] ss:$16 sps:$4 sm:$0xff]  }
 0x3f4   :  { %2488 = vmatpush1.bf16.msra.mxu1 %v5271_v53  ;;  %2570 = vmatpush1.bf16.msra.mxu0 %v5274_v54  ;;  %v5349_v53 = vld [vmem:[#allocation10 + $0x3c0] ss:$16 sps:$4 sm:$0xff]   ;;  %v5352_v54 = vld [vmem:[#allocation10 + $0x3c8] ss:$16 sps:$4 sm:$0xff]  }
 0x3f5   :  { %2489 = vmatprep.subr.bf16.mxu1 %v5279_v55  ;;  %2571 = vmatprep.subr.bf16.mxu0 %v5282_v56  ;;  %v1645_v55 = vmul.f32 0.01, %v4875_v48  ;;  %v5360_v56 = vld [vmem:[#allocation10 + $0x3ec] ss:$16 sps:$4 sm:$0xff]  }
 0x3f8   :  { %2490 = vmatpush1.bf16.msra.mxu1 %v5277_v57  ;;  %2572 = vmatpush1.bf16.msra.mxu0 %v5280_v58  ;;  %v5355_v57 = vld [vmem:[#allocation10 + $0x3e0] ss:$16 sps:$4 sm:$0xff]   ;;  %v5358_v58 = vld [vmem:[#allocation10 + $0x3e8] ss:$16 sps:$4 sm:$0xff]  }
 0x3f9   :  { %2491 = vmatprep.subr.bf16.mxu1 %v5285_v59  ;;  %2573 = vmatprep.subr.bf16.mxu0 %v5288_v60  ;;  %v1649_v59 = vmax.f32 %v4875_v48, %v1645_v55  ;;  %v5366_v60 = vld [vmem:[#allocation11 + $0xc] ss:$16 sps:$4 sm:$0xff]   ;;  %v5433_v55 = vld [vmem:[#allocation11 + $0x180] ss:$16 sps:$4 sm:$0xff]  }
 0x3fa   :  { %v5432_v48 = vld [vmem:[#allocation11 + $0x16c] ss:$16 sps:$4 sm:$0xff]  }
 0x3fc   :  { %2492 = vmatpush1.bf16.msra.mxu1 %v5283_v62  ;;  %2574 = vmatpush1.bf16.msra.mxu0 %v5286_v63  ;;  %v5361_v62 = vld [vmem:[#allocation11] ss:$16 sps:$4 sm:$0xff]   ;;  %v6136_v63 = vpack.c.bf16 %v1649_v59, %v1649_v59  ;;  %v5442_v59 = vld [vmem:[#allocation11 + $0x1a8] ss:$16 sps:$4 sm:$0xff]  }
 0x3fd   :  { %2493 = vmatprep.subr.bf16.mxu1 %v5291_v0  ;;  %2575 = vmatprep.subr.bf16.mxu0 %v5294_v1  ;;  %v5364_v0 = vld [vmem:[#allocation11 + $0x8] ss:$16 sps:$4 sm:$0xff]   ;;  %v5369_v1 = vld [vmem:[#allocation11 + $0x24] ss:$16 sps:$4 sm:$0xff]  }
 0x400   :  { %2494 = vmatpush1.bf16.msra.mxu1 %v5289_v2  ;;  %2576 = vmatpush1.bf16.msra.mxu0 %v5292_v3  ;;  %v5372_v2 = vld [vmem:[#allocation11 + $0x2c] ss:$16 sps:$4 sm:$0xff]   ;;  %v5367_v3 = vld [vmem:[#allocation11 + $0x20] ss:$16 sps:$4 sm:$0xff]  }
 0x401   :  { %2495 = vmatprep.subr.bf16.mxu1 %v5297_v4  ;;  %2577 = vmatprep.subr.bf16.mxu0 %v5300_v5  ;;  %v5370_v4 = vld [vmem:[#allocation11 + $0x28] ss:$16 sps:$4 sm:$0xff]   ;;  %v5375_v5 = vld [vmem:[#allocation11 + $0x44] ss:$16 sps:$4 sm:$0xff]  }
 0x404   :  { %2496 = vmatpush1.bf16.msra.mxu1 %v5295_v46  ;;  %2578 = vmatpush1.bf16.msra.mxu0 %v5298_v6  ;;  %v5378_v46 = vld [vmem:[#allocation11 + $0x4c] ss:$16 sps:$4 sm:$0xff]   ;;  %v5373_v6 = vld [vmem:[#allocation11 + $0x40] ss:$16 sps:$4 sm:$0xff]  }
 0x405   :  { %2497 = vmatprep.subr.bf16.mxu1 %v5303_v43  ;;  %2579 = vmatprep.subr.bf16.mxu0 %v5306_v45  ;;  %v5376_v43 = vld [vmem:[#allocation11 + $0x48] ss:$16 sps:$4 sm:$0xff]   ;;  %v5381_v45 = vld [vmem:[#allocation11 + $0x64] ss:$16 sps:$4 sm:$0xff]  }
 0x408   :  { %2498 = vmatpush1.bf16.msra.mxu1 %v5301_v44  ;;  %2580 = vmatpush1.bf16.msra.mxu0 %v5304_v7  ;;  %v5384_v44 = vld [vmem:[#allocation11 + $0x6c] ss:$16 sps:$4 sm:$0xff]   ;;  %v5379_v7 = vld [vmem:[#allocation11 + $0x60] ss:$16 sps:$4 sm:$0xff]  }
 0x409   :  { %2499 = vmatprep.subr.bf16.mxu1 %v5309_v8  ;;  %2581 = vmatprep.subr.bf16.mxu0 %v5312_v9  ;;  %v5382_v8 = vld [vmem:[#allocation11 + $0x68] ss:$16 sps:$4 sm:$0xff]   ;;  %v5387_v9 = vld [vmem:[#allocation11 + $0x84] ss:$16 sps:$4 sm:$0xff]  }
 0x40c   :  { %2500 = vmatpush1.bf16.msra.mxu1 %v5307_v10  ;;  %2582 = vmatpush1.bf16.msra.mxu0 %v5310_v11  ;;  %v5385_v10 = vld [vmem:[#allocation11 + $0x80] ss:$16 sps:$4 sm:$0xff]   ;;  %v5388_v11 = vld [vmem:[#allocation11 + $0x88] ss:$16 sps:$4 sm:$0xff]  }
 0x40d   :  { %2501 = vmatprep.subr.bf16.mxu1 %v5315_v12  ;;  %2583 = vmatprep.subr.bf16.mxu0 %v5318_v13  ;;  %v5393_v12 = vld [vmem:[#allocation11 + $0xa4] ss:$16 sps:$4 sm:$0xff]   ;;  %v5396_v13 = vld [vmem:[#allocation11 + $0xac] ss:$16 sps:$4 sm:$0xff]  }
 0x410   :  { %2502 = vmatpush1.bf16.msra.mxu1 %v5313_v14  ;;  %2584 = vmatpush1.bf16.msra.mxu0 %v5316_v15  ;;  %v5391_v14 = vld [vmem:[#allocation11 + $0xa0] ss:$16 sps:$4 sm:$0xff]   ;;  %v5394_v15 = vld [vmem:[#allocation11 + $0xa8] ss:$16 sps:$4 sm:$0xff]  }
 0x411   :  { %2503 = vmatprep.subr.bf16.mxu1 %v5321_v16  ;;  %2585 = vmatprep.subr.bf16.mxu0 %v5324_v61  ;;  %v5399_v16 = vld [vmem:[#allocation11 + $0xc4] ss:$16 sps:$4 sm:$0xff]   ;;  %v5402_v61 = vld [vmem:[#allocation11 + $0xcc] ss:$16 sps:$4 sm:$0xff]  }
 0x414   :  { %2504 = vmatpush1.bf16.msra.mxu1 %v5319_v18  ;;  %2586 = vmatpush1.bf16.msra.mxu0 %v5322_v19  ;;  %v5397_v18 = vld [vmem:[#allocation11 + $0xc0] ss:$16 sps:$4 sm:$0xff]   ;;  %v5400_v19 = vld [vmem:[#allocation11 + $0xc8] ss:$16 sps:$4 sm:$0xff]  }
 0x415   :  { %2505 = vmatprep.subr.bf16.mxu1 %v5327_v20  ;;  %2587 = vmatprep.subr.bf16.mxu0 %v5330_v23  ;;  %v5405_v20 = vld [vmem:[#allocation11 + $0xe4] ss:$16 sps:$4 sm:$0xff]   ;;  %v5408_v23 = vld [vmem:[#allocation11 + $0xec] ss:$16 sps:$4 sm:$0xff]  }
 0x418   :  { %2506 = vmatpush1.bf16.msra.mxu1 %v5325_v24  ;;  %2588 = vmatpush1.bf16.msra.mxu0 %v5328_v25  ;;  %v5403_v24 = vld [vmem:[#allocation11 + $0xe0] ss:$16 sps:$4 sm:$0xff]   ;;  %v5406_v25 = vld [vmem:[#allocation11 + $0xe8] ss:$16 sps:$4 sm:$0xff]  }
 0x419   :  { %2507 = vmatprep.subr.bf16.mxu1 %v5333_v26  ;;  %2589 = vmatprep.subr.bf16.mxu0 %v5336_v27  ;;  %v5411_v26 = vld [vmem:[#allocation11 + $0x104] ss:$16 sps:$4 sm:$0xff]   ;;  %v5414_v27 = vld [vmem:[#allocation11 + $0x10c] ss:$16 sps:$4 sm:$0xff]  }
 0x41c   :  { %2508 = vmatpush1.bf16.msra.mxu1 %v5331_v28  ;;  %2590 = vmatpush1.bf16.msra.mxu0 %v5334_v29  ;;  %v5409_v28 = vld [vmem:[#allocation11 + $0x100] ss:$16 sps:$4 sm:$0xff]   ;;  %v5412_v29 = vld [vmem:[#allocation11 + $0x108] ss:$16 sps:$4 sm:$0xff]  }
 0x41d   :  { %2509 = vmatprep.subr.bf16.mxu1 %v5339_v30  ;;  %2591 = vmatprep.subr.bf16.mxu0 %v5342_v31  ;;  %v5417_v30 = vld [vmem:[#allocation11 + $0x124] ss:$16 sps:$4 sm:$0xff]   ;;  %v5420_v31 = vld [vmem:[#allocation11 + $0x12c] ss:$16 sps:$4 sm:$0xff]  }
 0x420   :  { %2510 = vmatpush1.bf16.msra.mxu1 %v5337_v32  ;;  %2592 = vmatpush1.bf16.msra.mxu0 %v5340_v33  ;;  %v5415_v32 = vld [vmem:[#allocation11 + $0x120] ss:$16 sps:$4 sm:$0xff]   ;;  %v5418_v33 = vld [vmem:[#allocation11 + $0x128] ss:$16 sps:$4 sm:$0xff]  }
 0x421   :  { %2511 = vmatprep.subr.bf16.mxu1 %v5345_v36  ;;  %2593 = vmatprep.subr.bf16.mxu0 %v5348_v37  ;;  %v5426_v36 = vld [vmem:[#allocation11 + $0x14c] ss:$16 sps:$4 sm:$0xff]   ;;  %v5421_v37 = vld [vmem:[#allocation11 + $0x140] ss:$16 sps:$4 sm:$0xff]  }
 0x424   :  { %2512 = vmatpush1.bf16.msra.mxu1 %v5343_v41  ;;  %2594 = vmatpush1.bf16.msra.mxu0 %v5346_v47  ;;  %v5424_v41 = vld [vmem:[#allocation11 + $0x148] ss:$16 sps:$4 sm:$0xff]   ;;  %v5429_v47 = vld [vmem:[#allocation11 + $0x164] ss:$16 sps:$4 sm:$0xff]  }
 0x425   :  { %2513 = vmatprep.subr.bf16.mxu1 %v5351_v50  ;;  %2595 = vmatprep.subr.bf16.mxu0 %v5354_v51  ;;  %v5427_v50 = vld [vmem:[#allocation11 + $0x160] ss:$16 sps:$4 sm:$0xff]   ;;  %v5430_v51 = vld [vmem:[#allocation11 + $0x168] ss:$16 sps:$4 sm:$0xff]  }
 0x428   :  { %2514 = vmatpush1.bf16.msra.mxu1 %v5349_v53  ;;  %2596 = vmatpush1.bf16.msra.mxu0 %v5352_v54  ;;  %v5435_v53 = vld [vmem:[#allocation11 + $0x184] ss:$16 sps:$4 sm:$0xff]   ;;  %v5438_v54 = vld [vmem:[#allocation11 + $0x18c] ss:$16 sps:$4 sm:$0xff]  }
 0x429   :  { %2515 = vmatprep.subr.bf16.mxu1 %v5357_v17  ;;  %2597 = vmatprep.subr.bf16.mxu0 %v5360_v56  ;;  %v5436_v17 = vld [vmem:[#allocation11 + $0x188] ss:$16 sps:$4 sm:$0xff]   ;;  %v5441_v56 = vld [vmem:[#allocation11 + $0x1a4] ss:$16 sps:$4 sm:$0xff]  }
 0x42c   :  { %2516 = vmatpush1.bf16.msra.mxu1 %v5355_v57  ;;  %2598 = vmatpush1.bf16.msra.mxu0 %v5358_v58  ;;  %v5444_v57 = vld [vmem:[#allocation11 + $0x1ac] ss:$16 sps:$4 sm:$0xff]   ;;  %v5439_v58 = vld [vmem:[#allocation11 + $0x1a0] ss:$16 sps:$4 sm:$0xff]  }
 0x42d   :  { %3401 = vmatprep.subr.bf16.mxu1 %v5363_v22  ;;  %3483 = vmatprep.subr.bf16.mxu0 %v5366_v60  ;;  %v5447_v22 = vld [vmem:[#allocation11 + $0x1c4] ss:$16 sps:$4 sm:$0xff]   ;;  %v5450_v60 = vld [vmem:[#allocation11 + $0x1cc] ss:$16 sps:$4 sm:$0xff]  }
 0x42f   :  { %2518 = vmatmul.mubr.bf16.vlgmr.msra.gmra.mrb[8].mxu1 %v6136_v63  ;;  %2600 = vmatmul.mubr.bf16.vlgmr.msra.gmra.mrb[12].mxu0 %v6136_v63 }
 0x430   :  { %3402 = vmatpush1.bf16.msra.mxu1 %v5361_v62  ;;  %3433 = vmatprep.mubr.bf16.mxu1 %v6121_v42  ;;  %v5445_v62 = vld [vmem:[#allocation11 + $0x1c0] ss:$16 sps:$4 sm:$0xff]  }
 0x431   :  { %3484 = vmatpush1.bf16.msra.mxu0 %v5364_v0  ;;  %3515 = vmatprep.mubr.bf16.mxu0 %v6121_v42  ;;  %v5390_v42 = vld [vmem:[#allocation11 + $0x8c] ss:$16 sps:$4 sm:$0xff]   ;;  %v5448_v0 = vld [vmem:[#allocation11 + $0x1c8] ss:$16 sps:$4 sm:$0xff]  }
 0x432   :  { %3403 = vmatprep.subr.bf16.mxu1 %v5369_v1  ;;  %3485 = vmatprep.subr.bf16.mxu0 %v5372_v2  ;;  %v5453_v1 = vld [vmem:[#allocation11 + $0x1e4] ss:$16 sps:$4 sm:$0xff]   ;;  %v5456_v2 = vld [vmem:[#allocation11 + $0x1ec] ss:$16 sps:$4 sm:$0xff]  }
 0x434   :  { %3404 = vmatpush1.bf16.msra.mxu1 %v5367_v3  ;;  %v5451_v3 = vld [vmem:[#allocation11 + $0x1e0] ss:$16 sps:$4 sm:$0xff]  }
 0x435   :  { %3486 = vmatpush1.bf16.msra.mxu0 %v5370_v4  ;;  %3405 = vmatprep.subr.bf16.mxu1 %v5375_v5  ;;  %v5454_v4 = vld [vmem:[#allocation11 + $0x1e8] ss:$16 sps:$4 sm:$0xff]   ;;  %v5459_v5 = vld [vmem:[#allocation11 + $0x204] ss:$16 sps:$4 sm:$0xff]  }
 0x436   :  { %3487 = vmatprep.subr.bf16.mxu0 %v5378_v46  ;;  %v5462_v46 = vld [vmem:[#allocation11 + $0x20c] ss:$16 sps:$4 sm:$0xff]  }
 0x438   :  { %3406 = vmatpush1.bf16.msra.mxu1 %v5373_v6  ;;  %v5457_v6 = vld [vmem:[#allocation11 + $0x200] ss:$16 sps:$4 sm:$0xff]  }
 0x439   :  { %3488 = vmatpush1.bf16.msra.mxu0 %v5376_v43  ;;  %3407 = vmatprep.subr.bf16.mxu1 %v5381_v45  ;;  %v5460_v43 = vld [vmem:[#allocation11 + $0x208] ss:$16 sps:$4 sm:$0xff]   ;;  %v5465_v45 = vld [vmem:[#allocation11 + $0x224] ss:$16 sps:$4 sm:$0xff]  }
 0x43a   :  { %3489 = vmatprep.subr.bf16.mxu0 %v5384_v44  ;;  %v5468_v44 = vld [vmem:[#allocation11 + $0x22c] ss:$16 sps:$4 sm:$0xff]  }
 0x43c   :  { %3408 = vmatpush1.bf16.msra.mxu1 %v5379_v7  ;;  %v5463_v7 = vld [vmem:[#allocation11 + $0x220] ss:$16 sps:$4 sm:$0xff]  }
 0x43d   :  { %3490 = vmatpush1.bf16.msra.mxu0 %v5382_v8  ;;  %3409 = vmatprep.subr.bf16.mxu1 %v5387_v9  ;;  %v5466_v8 = vld [vmem:[#allocation11 + $0x228] ss:$16 sps:$4 sm:$0xff]   ;;  %v5471_v9 = vld [vmem:[#allocation11 + $0x244] ss:$16 sps:$4 sm:$0xff]  }
 0x43e   :  { %3491 = vmatprep.subr.bf16.mxu0 %v5390_v42  ;;  %v5474_v42 = vld [vmem:[#allocation11 + $0x24c] ss:$16 sps:$4 sm:$0xff]  }
 0x440   :  { %3410 = vmatpush1.bf16.msra.mxu1 %v5385_v10  ;;  %v5469_v10 = vld [vmem:[#allocation11 + $0x240] ss:$16 sps:$4 sm:$0xff]  }
 0x441   :  { %3492 = vmatpush1.bf16.msra.mxu0 %v5388_v11  ;;  %3411 = vmatprep.subr.bf16.mxu1 %v5393_v12  ;;  %v5472_v11 = vld [vmem:[#allocation11 + $0x248] ss:$16 sps:$4 sm:$0xff]   ;;  %v5477_v12 = vld [vmem:[#allocation11 + $0x264] ss:$16 sps:$4 sm:$0xff]  }
 0x442   :  { %3493 = vmatprep.subr.bf16.mxu0 %v5396_v13  ;;  %v5475_v13 = vld [vmem:[#allocation11 + $0x260] ss:$16 sps:$4 sm:$0xff]  }
 0x444   :  { %3412 = vmatpush1.bf16.msra.mxu1 %v5391_v14  ;;  %v5478_v14 = vld [vmem:[#allocation11 + $0x268] ss:$16 sps:$4 sm:$0xff]  }
 0x445   :  { %3494 = vmatpush1.bf16.msra.mxu0 %v5394_v15  ;;  %3413 = vmatprep.subr.bf16.mxu1 %v5399_v16  ;;  %v5483_v15 = vld [vmem:[#allocation11 + $0x284] ss:$16 sps:$4 sm:$0xff]   ;;  %v5486_v16 = vld [vmem:[#allocation11 + $0x28c] ss:$16 sps:$4 sm:$0xff]  }
 0x446   :  { %3495 = vmatprep.subr.bf16.mxu0 %v5402_v61  ;;  %v5484_v61 = vld [vmem:[#allocation11 + $0x288] ss:$16 sps:$4 sm:$0xff]  }
 0x448   :  { %3414 = vmatpush1.bf16.msra.mxu1 %v5397_v18  ;;  %v5489_v18 = vld [vmem:[#allocation11 + $0x2a4] ss:$16 sps:$4 sm:$0xff]  }
 0x449   :  { %3496 = vmatpush1.bf16.msra.mxu0 %v5400_v19  ;;  %3415 = vmatprep.subr.bf16.mxu1 %v5405_v20  ;;  %v5492_v19 = vld [vmem:[#allocation11 + $0x2ac] ss:$16 sps:$4 sm:$0xff]   ;;  %v5487_v20 = vld [vmem:[#allocation11 + $0x2a0] ss:$16 sps:$4 sm:$0xff]  }
 0x44a   :  { %3497 = vmatprep.subr.bf16.mxu0 %v5408_v23  ;;  %v5490_v23 = vld [vmem:[#allocation11 + $0x2a8] ss:$16 sps:$4 sm:$0xff]  }
 0x44c   :  { %3416 = vmatpush1.bf16.msra.mxu1 %v5403_v24  ;;  %v5495_v24 = vld [vmem:[#allocation11 + $0x2c4] ss:$16 sps:$4 sm:$0xff]  }
 0x44d   :  { %3498 = vmatpush1.bf16.msra.mxu0 %v5406_v25  ;;  %3417 = vmatprep.subr.bf16.mxu1 %v5411_v26  ;;  %v5498_v25 = vld [vmem:[#allocation11 + $0x2cc] ss:$16 sps:$4 sm:$0xff]   ;;  %v5493_v26 = vld [vmem:[#allocation11 + $0x2c0] ss:$16 sps:$4 sm:$0xff]  }
 0x44e   :  { %3499 = vmatprep.subr.bf16.mxu0 %v5414_v27  ;;  %v5496_v27 = vld [vmem:[#allocation11 + $0x2c8] ss:$16 sps:$4 sm:$0xff]  }
 0x450   :  { %3418 = vmatpush1.bf16.msra.mxu1 %v5409_v28  ;;  %v5501_v28 = vld [vmem:[#allocation11 + $0x2e4] ss:$16 sps:$4 sm:$0xff]  }
 0x451   :  { %3500 = vmatpush1.bf16.msra.mxu0 %v5412_v29  ;;  %3419 = vmatprep.subr.bf16.mxu1 %v5417_v30  ;;  %v5504_v29 = vld [vmem:[#allocation11 + $0x2ec] ss:$16 sps:$4 sm:$0xff]   ;;  %v5499_v30 = vld [vmem:[#allocation11 + $0x2e0] ss:$16 sps:$4 sm:$0xff]  }
 0x452   :  { %3501 = vmatprep.subr.bf16.mxu0 %v5420_v31  ;;  %v5502_v31 = vld [vmem:[#allocation11 + $0x2e8] ss:$16 sps:$4 sm:$0xff]  }
 0x454   :  { %3420 = vmatpush1.bf16.msra.mxu1 %v5415_v32  ;;  %v5507_v32 = vld [vmem:[#allocation11 + $0x304] ss:$16 sps:$4 sm:$0xff]  }
 0x455   :  { %3502 = vmatpush1.bf16.msra.mxu0 %v5418_v33  ;;  %3421 = vmatprep.subr.bf16.mxu1 %v5423_v34  ;;  %v5510_v33 = vld [vmem:[#allocation11 + $0x30c] ss:$16 sps:$4 sm:$0xff]   ;;  %v5505_v34 = vld [vmem:[#allocation11 + $0x300] ss:$16 sps:$4 sm:$0xff]  }
 0x456   :  { %3503 = vmatprep.subr.bf16.mxu0 %v5426_v36  ;;  %v5508_v36 = vld [vmem:[#allocation11 + $0x308] ss:$16 sps:$4 sm:$0xff]  }
 0x458   :  { %3422 = vmatpush1.bf16.msra.mxu1 %v5421_v37  ;;  %v5513_v37 = vld [vmem:[#allocation11 + $0x324] ss:$16 sps:$4 sm:$0xff]  }
 0x459   :  { %3504 = vmatpush1.bf16.msra.mxu0 %v5424_v41  ;;  %3423 = vmatprep.subr.bf16.mxu1 %v5429_v47  ;;  %v5516_v41 = vld [vmem:[#allocation11 + $0x32c] ss:$16 sps:$4 sm:$0xff]   ;;  %v5511_v47 = vld [vmem:[#allocation11 + $0x320] ss:$16 sps:$4 sm:$0xff]  }
 0x45a   :  { %3505 = vmatprep.subr.bf16.mxu0 %v5432_v48  ;;  %v5514_v48 = vld [vmem:[#allocation11 + $0x328] ss:$16 sps:$4 sm:$0xff]  }
 0x45c   :  { %3424 = vmatpush1.bf16.msra.mxu1 %v5427_v50  ;;  %v5519_v50 = vld [vmem:[#allocation11 + $0x344] ss:$16 sps:$4 sm:$0xff]  }
 0x45d   :  { %3506 = vmatpush1.bf16.msra.mxu0 %v5430_v51  ;;  %3425 = vmatprep.subr.bf16.mxu1 %v5435_v53  ;;  %v5522_v51 = vld [vmem:[#allocation11 + $0x34c] ss:$16 sps:$4 sm:$0xff]   ;;  %v5517_v53 = vld [vmem:[#allocation11 + $0x340] ss:$16 sps:$4 sm:$0xff]  }
 0x45e   :  { %3507 = vmatprep.subr.bf16.mxu0 %v5438_v54  ;;  %v5520_v54 = vld [vmem:[#allocation11 + $0x348] ss:$16 sps:$4 sm:$0xff]  }
 0x460   :  { %3426 = vmatpush1.bf16.msra.mxu1 %v5433_v55  ;;  %v5525_v55 = vld [vmem:[#allocation11 + $0x364] ss:$16 sps:$4 sm:$0xff]  }
 0x461   :  { %3508 = vmatpush1.bf16.msra.mxu0 %v5436_v17  ;;  %3427 = vmatprep.subr.bf16.mxu1 %v5441_v56  ;;  %v5528_v17 = vld [vmem:[#allocation11 + $0x36c] ss:$16 sps:$4 sm:$0xff]   ;;  %v5523_v56 = vld [vmem:[#allocation11 + $0x360] ss:$16 sps:$4 sm:$0xff]  }
 0x462   :  { %3509 = vmatprep.subr.bf16.mxu0 %v5444_v57  ;;  %v5526_v57 = vld [vmem:[#allocation11 + $0x368] ss:$16 sps:$4 sm:$0xff]  }
 0x464   :  { %3428 = vmatpush1.bf16.msra.mxu1 %v5439_v58  ;;  %v5531_v58 = vld [vmem:[#allocation11 + $0x384] ss:$16 sps:$4 sm:$0xff]  }
 0x465   :  { %3510 = vmatpush1.bf16.msra.mxu0 %v5442_v59  ;;  %3429 = vmatprep.subr.bf16.mxu1 %v5447_v22  ;;  %v5534_v59 = vld [vmem:[#allocation11 + $0x38c] ss:$16 sps:$4 sm:$0xff]   ;;  %v5529_v22 = vld [vmem:[#allocation11 + $0x380] ss:$16 sps:$4 sm:$0xff]  }
 0x466   :  { %3511 = vmatprep.subr.bf16.mxu0 %v5450_v60  ;;  %v5532_v60 = vld [vmem:[#allocation11 + $0x388] ss:$16 sps:$4 sm:$0xff]  }
 0x468   :  { %3430 = vmatpush1.bf16.msra.mxu1 %v5445_v62  ;;  %v5537_v62 = vld [vmem:[#allocation11 + $0x3a4] ss:$16 sps:$4 sm:$0xff]  }
 0x469   :  { %3512 = vmatpush1.bf16.msra.mxu0 %v5448_v0  ;;  %3431 = vmatprep.subr.bf16.mxu1 %v5453_v1  ;;  %v5540_v0 = vld [vmem:[#allocation11 + $0x3ac] ss:$16 sps:$4 sm:$0xff]   ;;  %v5535_v1 = vld [vmem:[#allocation11 + $0x3a0] ss:$16 sps:$4 sm:$0xff]  }
 0x46a   :  { %3513 = vmatprep.subr.bf16.mxu0 %v5456_v2  ;;  %v5538_v2 = vld [vmem:[#allocation11 + $0x3a8] ss:$16 sps:$4 sm:$0xff]  }
 0x46c   :  { %3432 = vmatpush1.bf16.msra.mxu1 %v5451_v3  ;;  %v5543_v3 = vld [vmem:[#allocation11 + $0x3c4] ss:$16 sps:$4 sm:$0xff]  }
 0x46d   :  { %3514 = vmatpush1.bf16.msra.mxu0 %v5454_v4  ;;  %3442 = vmatprep.subr.bf16.mxu1 %v5459_v5  ;;  %v5546_v4 = vld [vmem:[#allocation11 + $0x3cc] ss:$16 sps:$4 sm:$0xff]   ;;  %v5541_v5 = vld [vmem:[#allocation11 + $0x3c0] ss:$16 sps:$4 sm:$0xff]  }
 0x46e   :  { %3524 = vmatprep.subr.bf16.mxu0 %v5462_v46  ;;  %v5544_v46 = vld [vmem:[#allocation11 + $0x3c8] ss:$16 sps:$4 sm:$0xff]  }
 0x46f   :  { %3434 = vmatmul.mubr.bf16.vlgmr.msra.gmra.mrb[12].mxu1 %v6123_v49 }
 0x470   :  { %3516 = vmatmul.mubr.bf16.vlgmr.msra.gmra.mrb[16].mxu0 %v6123_v49  ;;  %3443 = vmatpush1.bf16.msra.mxu1 %v5457_v6  ;;  %v5480_v49 = vld [vmem:[#allocation11 + $0x26c] ss:$16 sps:$4 sm:$0xff]   ;;  %v5549_v6 = vld [vmem:[#allocation11 + $0x3e4] ss:$16 sps:$4 sm:$0xff]  }
 0x471   :  { %3474 = vmatprep.mubr.bf16.mxu1 %v6127_v52  ;;  %3525 = vmatpush1.bf16.msra.mxu0 %v5460_v43  ;;  %v5552_v43 = vld [vmem:[#allocation11 + $0x3ec] ss:$16 sps:$4 sm:$0xff]  }
 0x472   :  { %3556 = vmatprep.mubr.bf16.mxu0 %v6127_v52  ;;  %3444 = vmatprep.subr.bf16.mxu1 %v5465_v45  ;;  %v5481_v52 = vld [vmem:[#allocation11 + $0x280] ss:$16 sps:$4 sm:$0xff]  }
 0x473   :  { %3526 = vmatprep.subr.bf16.mxu0 %v5468_v44  ;;  %v5547_v45 = vld [vmem:[#allocation11 + $0x3e0] ss:$16 sps:$4 sm:$0xff]   ;;  %v5550_v44 = vld [vmem:[#allocation11 + $0x3e8] ss:$16 sps:$4 sm:$0xff]  }
 0x474   :  { %3445 = vmatpush1.bf16.msra.mxu1 %v5463_v7  ;;  %v5553_v7 = vld [vmem:[#allocation14 + $0x40] sm:$0xff]  }
 0x475   :  { %3527 = vmatpush1.bf16.msra.mxu0 %v5466_v8  ;;  %3446 = vmatprep.subr.bf16.mxu1 %v5471_v9  ;;  %v5554_v8 = vld [vmem:[#allocation14 + $0xc0] sm:$0xff]  }
 0x476   :  { %3528 = vmatprep.subr.bf16.mxu0 %v5474_v42  ;;  %v5555_v9 = vld [vmem:[#allocation14] sm:$0xff]  }
 0x477   :  { %v5556_v42 = vld [vmem:[#allocation14 + $0x80] sm:$0xff]  }
 0x478   :  { %3447 = vmatpush1.bf16.msra.mxu1 %v5469_v10  ;;  %v5557_v10 = vld [vmem:[#allocation14 + $0x48] sm:$0xff]  }
 0x479   :  { %3529 = vmatpush1.bf16.msra.mxu0 %v5472_v11  ;;  %3448 = vmatprep.subr.bf16.mxu1 %v5477_v12  ;;  %v5558_v11 = vld [vmem:[#allocation14 + $0xc8] sm:$0xff]  }
 0x47a   :  { %3530 = vmatprep.subr.bf16.mxu0 %v5480_v49  ;;  %v5559_v12 = vld [vmem:[#allocation14 + $0x8] sm:$0xff]  }
 0x47b   :  { %v5560_v49 = vld [vmem:[#allocation14 + $0x88] sm:$0xff]  }
 0x47c   :  { %3449 = vmatpush1.bf16.msra.mxu1 %v5475_v13  ;;  %v5561_v13 = vld [vmem:[#allocation14 + $0x50] sm:$0xff]  }
 0x47d   :  { %3531 = vmatpush1.bf16.msra.mxu0 %v5478_v14  ;;  %3450 = vmatprep.subr.bf16.mxu1 %v5483_v15  ;;  %v5562_v14 = vld [vmem:[#allocation14 + $0xd0] sm:$0xff]  }
 0x47e   :  { %3532 = vmatprep.subr.bf16.mxu0 %v5486_v16  ;;  %v5563_v15 = vld [vmem:[#allocation14 + $0x10] sm:$0xff]  }
 0x47f   :  { %v5564_v16 = vld [vmem:[#allocation14 + $0x90] sm:$0xff]  }
 0x480   :  { %3451 = vmatpush1.bf16.msra.mxu1 %v5481_v52  ;;  %v5565_v52 = vld [vmem:[#allocation14 + $0x58] sm:$0xff]  }
 0x481   :  { %3533 = vmatpush1.bf16.msra.mxu0 %v5484_v61  ;;  %3452 = vmatprep.subr.bf16.mxu1 %v5489_v18  ;;  %v5566_v61 = vld [vmem:[#allocation14 + $0xd8] sm:$0xff]  }
 0x482   :  { %3534 = vmatprep.subr.bf16.mxu0 %v5492_v19  ;;  %v5567_v18 = vld [vmem:[#allocation14 + $0x18] sm:$0xff]   ;;  %v5569_v19 = vld [vmem:[#allocation14 + $0x60] sm:$0xff]  }
 0x484   :  { %3453 = vmatpush1.bf16.msra.mxu1 %v5487_v20  ;;  %v5570_v20 = vld [vmem:[#allocation14 + $0xe0] sm:$0xff]  }
 0x485   :  { %3535 = vmatpush1.bf16.msra.mxu0 %v5490_v23  ;;  %3454 = vmatprep.subr.bf16.mxu1 %v5495_v24  ;;  %v5571_v23 = vld [vmem:[#allocation14 + $0x20] sm:$0xff]  }
 0x486   :  { %3536 = vmatprep.subr.bf16.mxu0 %v5498_v25  ;;  %v5572_v24 = vld [vmem:[#allocation14 + $0xa0] sm:$0xff]   ;;  %v5573_v25 = vld [vmem:[#allocation14 + $0x68] sm:$0xff]  }
 0x488   :  { %3455 = vmatpush1.bf16.msra.mxu1 %v5493_v26  ;;  %v5574_v26 = vld [vmem:[#allocation14 + $0xe8] sm:$0xff]  }
 0x489   :  { %3537 = vmatpush1.bf16.msra.mxu0 %v5496_v27  ;;  %3456 = vmatprep.subr.bf16.mxu1 %v5501_v28  ;;  %v5575_v27 = vld [vmem:[#allocation14 + $0x28] sm:$0xff]  }
 0x48a   :  { %3538 = vmatprep.subr.bf16.mxu0 %v5504_v29  ;;  %v5576_v28 = vld [vmem:[#allocation14 + $0xa8] sm:$0xff]  }
 0x48c   :  { %3457 = vmatpush1.bf16.msra.mxu1 %v5499_v30 }
 0x48d   :  { %3539 = vmatpush1.bf16.msra.mxu0 %v5502_v31  ;;  %3458 = vmatprep.subr.bf16.mxu1 %v5507_v32 }
 0x48e   :  { %3540 = vmatprep.subr.bf16.mxu0 %v5510_v33 }
 0x490   :  { %3459 = vmatpush1.bf16.msra.mxu1 %v5505_v34 }
 0x491   :  { %3541 = vmatpush1.bf16.msra.mxu0 %v5508_v36  ;;  %3460 = vmatprep.subr.bf16.mxu1 %v5513_v37  ;;  %v5577_v36 = vld [vmem:[#allocation14 + $0x70] sm:$0xff]  }
 0x492   :  { %3542 = vmatprep.subr.bf16.mxu0 %v5516_v41  ;;  %v5578_v37 = vld [vmem:[#allocation14 + $0xf0] sm:$0xff]  }
 0x494   :  { %3461 = vmatpush1.bf16.msra.mxu1 %v5511_v47 }
 0x495   :  { %3543 = vmatpush1.bf16.msra.mxu0 %v5514_v48  ;;  %3462 = vmatprep.subr.bf16.mxu1 %v5519_v50  ;;  %v5579_v48 = vld [vmem:[#allocation14 + $0x30] sm:$0xff]  }
 0x496   :  { %3544 = vmatprep.subr.bf16.mxu0 %v5522_v51  ;;  %v5580_v50 = vld [vmem:[#allocation14 + $0xb0] sm:$0xff]   ;;  %v5581_v51 = vld [vmem:[#allocation14 + $0x78] sm:$0xff]  }
 0x498   :  { %3463 = vmatpush1.bf16.msra.mxu1 %v5517_v53  ;;  %v5582_v53 = vld [vmem:[#allocation14 + $0xf8] sm:$0xff]  }
 0x499   :  { %3545 = vmatpush1.bf16.msra.mxu0 %v5520_v54  ;;  %3464 = vmatprep.subr.bf16.mxu1 %v5525_v55  ;;  %v5583_v54 = vld [vmem:[#allocation14 + $0x38] sm:$0xff]  }
 0x49a   :  { %3546 = vmatprep.subr.bf16.mxu0 %v5528_v17  ;;  %v5584_v55 = vld [vmem:[#allocation14 + $0xb8] sm:$0xff]   ;;  %v5585_v17 = vld [vmem:[#allocation13 + $0x40] sm:$0xff]  }
 0x49c   :  { %3465 = vmatpush1.bf16.msra.mxu1 %v5523_v56  ;;  %v5586_v56 = vld [vmem:[#allocation13 + $0xc0] sm:$0xff]  }
 0x49d   :  { %3547 = vmatpush1.bf16.msra.mxu0 %v5526_v57  ;;  %3466 = vmatprep.subr.bf16.mxu1 %v5531_v58  ;;  %v6152_v57 = vld [vmem:[#allocation16 + $0x5] ss:$8 sm:$0xf] }
 0x49e   :  { %3548 = vmatprep.subr.bf16.mxu0 %v5534_v59  ;;  %v1791_v58 = vrot.slane %v6152_v57, %v6089_v38  ;;  %v1799_v59 = vrot.slane %v6152_v57, %v6087_v35 }
 0x4a0   :  { %3467 = vmatpush1.bf16.msra.mxu1 %v5529_v22 }
 0x4a1   :  { %3549 = vmatpush1.bf16.msra.mxu0 %v5532_v60  ;;  %3468 = vmatprep.subr.bf16.mxu1 %v5537_v62  ;;  %v163_v60 = vld [vmem:[#allocation16 + $0x6] ss:$8 sm:$0xf] }
 0x4a2   :  { %3550 = vmatprep.subr.bf16.mxu0 %v5540_v0  ;;  %v2744_v0 = vrot.slane %v163_v60, %v6091_v39 }
 0x4a4   :  { %3469 = vmatpush1.bf16.msra.mxu1 %v5535_v1  ;;  %v2752_v1 = vrot.slane %v163_v60, %v6093_v40 }
 0x4a5   :  { %3551 = vmatpush1.bf16.msra.mxu0 %v5538_v2  ;;  %3470 = vmatprep.subr.bf16.mxu1 %v5543_v3  ;;  %v2748_v2 = vrot.slane %v163_v60, %v6089_v38  ;;  %v2756_v3 = vrot.slane %v163_v60, %v6087_v35  ;;  %v5611_v60 = vld [vmem:[#allocation13 + $0x30] sm:$0xff]  }
 0x4a6   :  { %3552 = vmatprep.subr.bf16.mxu0 %v5546_v4 }
 0x4a8   :  { %3471 = vmatpush1.bf16.msra.mxu1 %v5541_v5 }
 0x4a9   :  { %3553 = vmatpush1.bf16.msra.mxu0 %v5544_v46  ;;  %3472 = vmatprep.subr.bf16.mxu1 %v5549_v6 }
 0x4aa   :  { %3554 = vmatprep.subr.bf16.mxu0 %v5552_v43 }
 0x4ac   :  { %3473 = vmatpush1.bf16.msra.mxu1 %v5547_v45 }
 0x4ad   :  { %3555 = vmatpush1.bf16.msra.mxu0 %v5550_v44  ;;  %4777 = vmatprep.subr.bf16.mxu1 %v5553_v7 }
 0x4ae   :  { %4799 = vmatprep.subr.bf16.mxu0 %v5554_v8 }
 0x4af   :  { %3475 = vmatmul.mubr.bf16.vlgmr.msra.gmra.mrb[12].mxu1 %v6136_v63 }
 0x4b0   :  { %3557 = vmatmul.mubr.bf16.vlgmr.msra.gmra.mrb[16].mxu0 %v6136_v63  ;;  %4778 = vmatpush3.bf16.msra.mxu1 %v5555_v9  ;;  %v5568_v63 = vld [vmem:[#allocation14 + $0x98] sm:$0xff]  }
 0x4b1   :  { %4800 = vmatpush3.bf16.msra.mxu0 %v5556_v42  ;;  %4779 = vmatprep.subr.bf16.mxu1 %v5557_v10 }
 0x4b2   :  { %4801 = vmatprep.subr.bf16.mxu0 %v5558_v11 }
 0x4b4   :  { %4780 = vmatpush3.bf16.msra.mxu1 %v5559_v12 }
 0x4b5   :  { %4802 = vmatpush3.bf16.msra.mxu0 %v5560_v49  ;;  %4781 = vmatprep.subr.bf16.mxu1 %v5561_v13 }
 0x4b6   :  { %4803 = vmatprep.subr.bf16.mxu0 %v5562_v14 }
 0x4b8   :  { %4782 = vmatpush3.bf16.msra.mxu1 %v5563_v15 }
 0x4b9   :  { %4804 = vmatpush3.bf16.msra.mxu0 %v5564_v16  ;;  %4783 = vmatprep.subr.bf16.mxu1 %v5565_v52 }
 0x4ba   :  { %4805 = vmatprep.subr.bf16.mxu0 %v5566_v61  ;;  %v5587_v61 = vld [vmem:[#allocation13] sm:$0xff]  }
 0x4bc   :  { %4784 = vmatpush3.bf16.msra.mxu1 %v5567_v18 }
 0x4bd   :  { %4806 = vmatpush3.bf16.msra.mxu0 %v5568_v63  ;;  %4785 = vmatprep.subr.bf16.mxu1 %v5569_v19 }
 0x4be   :  { %4807 = vmatprep.subr.bf16.mxu0 %v5570_v20  ;;  %v5588_v20 = vld [vmem:[#allocation13 + $0x80] sm:$0xff]  }
 0x4c0   :  { %4786 = vmatpush3.bf16.msra.mxu1 %v5571_v23 }
 0x4c1   :  { %4808 = vmatpush3.bf16.msra.mxu0 %v5572_v24  ;;  %4787 = vmatprep.subr.bf16.mxu1 %v5573_v25  ;;  %v5589_v24 = vld [vmem:[#allocation13 + $0x48] sm:$0xff]  }
 0x4c2   :  { %4809 = vmatprep.subr.bf16.mxu0 %v5574_v26  ;;  %v5590_v26 = vld [vmem:[#allocation13 + $0xc8] sm:$0xff]  }
 0x4c4   :  { %4788 = vmatpush3.bf16.msra.mxu1 %v5575_v27 }
 0x4c5   :  { %4810 = vmatpush3.bf16.msra.mxu0 %v5576_v28  ;;  %4789 = vmatprep.subr.bf16.mxu1 %v5577_v36  ;;  %v5591_v28 = vld [vmem:[#allocation13 + $0x8] sm:$0xff]   ;;  %v5596_v36 = vld [vmem:[#allocation13 + $0x90] sm:$0xff]  }
 0x4c6   :  { %4811 = vmatprep.subr.bf16.mxu0 %v5578_v37  ;;  %v5597_v37 = vld [vmem:[#allocation13 + $0x58] sm:$0xff]  }
 0x4c8   :  { %4790 = vmatpush3.bf16.msra.mxu1 %v5579_v48  ;;  %v5599_v48 = vld [vmem:[#allocation13 + $0x18] sm:$0xff]  }
 0x4c9   :  { %4812 = vmatpush3.bf16.msra.mxu0 %v5580_v50  ;;  %4791 = vmatprep.subr.bf16.mxu1 %v5581_v51  ;;  %v1795_v50 = vrot.slane %v6152_v57, %v6093_v40  ;;  %v5600_v51 = vld [vmem:[#allocation13 + $0x98] sm:$0xff]   ;;  %v5607_v40 = vld [vmem:[#allocation13 + $0x28] sm:$0xff]  }
 0x4ca   :  { %4813 = vmatprep.subr.bf16.mxu0 %v5582_v53  ;;  %v5601_v53 = vld [vmem:[#allocation13 + $0x60] sm:$0xff]  }
 0x4cc   :  { %4792 = vmatpush3.bf16.msra.mxu1 %v5583_v54  ;;  %v5602_v54 = vld [vmem:[#allocation13 + $0xe0] sm:$0xff]  }
 0x4cd   :  { %4814 = vmatpush3.bf16.msra.mxu0 %v5584_v55  ;;  %4821 = vmatprep.subr.bf16.mxu1 %v5585_v17  ;;  %v5603_v17 = vld [vmem:[#allocation13 + $0x20] sm:$0xff]  }
 0x4ce   :  { %4843 = vmatprep.subr.bf16.mxu0 %v5586_v56 }
 0x502   :  { %v6148_v29 = vpop.f32.mrb[8].mxu1  ;;  %v6150_v30 = vpop.f32.mrb[12].mxu0 }
 0x503   :  { %v2521_v31 = vpop.f32.mrb[9].mxu1  ;;  %v2603_v32 = vpop.f32.mrb[13].mxu0  ;;  %v4879_v56 = vadd.f32 %v6150_v30, %v1795_v50  ;;  %v5612_v30 = vld [vmem:[#allocation13 + $0xb0] sm:$0xff]  }
 0x504   :  { %v2523_v33 = vpop.f32.mrb[10].mxu1  ;;  %v2605_v34 = vpop.f32.mrb[14].mxu0  ;;  %v4878_v22 = vadd.f32 %v2521_v31, %v1791_v58  ;;  %v4880_v62 = vadd.f32 %v2603_v32, %v1799_v59  ;;  %v5592_v31 = vld [vmem:[#allocation13 + $0x88] sm:$0xff]   ;;  %v5593_v32 = vld [vmem:[#allocation13 + $0x50] sm:$0xff]  }
 0x505   :  { %v2524_v41 = vpop.f32.mrb[11].mxu1  ;;  %v2606_v47 = vpop.f32.mrb[15].mxu0  ;;  %v5594_v33 = vld [vmem:[#allocation13 + $0xd0] sm:$0xff]   ;;  %v5605_v58 = vld [vmem:[#allocation13 + $0x68] sm:$0xff]  }
 0x506   :  { %5627 = vtanh.f32 %v4878_v22  ;;  %v5595_v34 = vld [vmem:[#allocation13 + $0x10] sm:$0xff]   ;;  %v5598_v41 = vld [vmem:[#allocation13 + $0xd8] sm:$0xff]   ;;  %v1787_v47 = vrot.slane %v6152_v57, %v6091_v39  ;;  %v5604_v39 = vld [vmem:[#allocation13 + $0xa0] sm:$0xff]  }
 0x507   :  { %5629 = vtanh.f32 %v4880_v62  ;;  %v5606_v59 = vld [vmem:[#allocation13 + $0xe8] sm:$0xff]   ;;  %v5609_v22 = vld [vmem:[#allocation13 + $0x70] sm:$0xff]   ;;  %v5613_v62 = vld [vmem:[#allocation13 + $0x78] sm:$0xff]  }
 0x508   :  { %v4877_v55 = vadd.f32 %v6148_v29, %v1787_v47  ;;  %v5608_v57 = vld [vmem:[#allocation13 + $0xa8] sm:$0xff]   ;;  %v5610_v29 = vld [vmem:[#allocation13 + $0xf0] sm:$0xff]  }
 0x50a   :  { %5631 = vtanh.f32 %v4877_v55 }
 0x50b   :  { %5633 = vtanh.f32 %v4879_v56 }
 0x510   :  { %v5628_v16 = vpop.eup %5627 }
 0x511   :  { %v5630_v18 = vpop.eup %5629  ;;  %v3574_v25 = vpack.c.bf16 %v5628_v16, %v5628_v16 }
 0x512   :  { %v3576_v27 = vpack.c.bf16 %v5630_v18, %v5630_v18 }
 0x582   :  { %v3476_v4 = vpop.f32.mrb[12].mxu1 }
 0x583   :  { %v4881_v5 = vadd.f32 %v3476_v4, %v2744_v0  ;;  %v3558_v46 = vpop.f32.mrb[16].mxu0  ;;  %v3478_v6 = vpop.f32.mrb[13].mxu1  ;;  %v5614_v0 = vld [vmem:[#allocation13 + $0xf8] sm:$0xff]  }
 0x584   :  { %v4883_v43 = vadd.f32 %v3558_v46, %v2752_v1  ;;  %v4882_v45 = vadd.f32 %v3478_v6, %v2748_v2  ;;  %v3560_v44 = vpop.f32.mrb[17].mxu0  ;;  %v3480_v7 = vpop.f32.mrb[14].mxu1  ;;  %v5615_v1 = vld [vmem:[#allocation13 + $0x38] sm:$0xff]  }
 0x585   :  { %v3565_v8 = vmul.f32 0.01, %v4881_v5  ;;  %v4884_v9 = vadd.f32 %v3560_v44, %v2756_v3  ;;  %v3562_v42 = vpop.f32.mrb[18].mxu0  ;;  %v3481_v10 = vpop.f32.mrb[15].mxu1  ;;  %v5616_v2 = vld [vmem:[#allocation13 + $0xb8] sm:$0xff]  }
 0x586   :  { %v3567_v11 = vmul.f32 0.01, %v4883_v43  ;;  %v3566_v12 = vmul.f32 0.01, %v4882_v45  ;;  %v3563_v49 = vpop.f32.mrb[19].mxu0  ;;  %v5632_v3 = vpop.eup %5631 }
 0x587   :  { %v3569_v13 = vmax.f32 %v4881_v5, %v3565_v8  ;;  %v3568_v38 = vmul.f32 0.01, %v4884_v9  ;;  %v5634_v4 = vpop.eup %5633  ;;  %v3573_v5 = vpack.c.bf16 %v5632_v3, %v5632_v3 }
 0x588   :  { %v3571_v14 = vmax.f32 %v4883_v43, %v3567_v11  ;;  %v3570_v15 = vmax.f32 %v4882_v45, %v3566_v12  ;;  %v3575_v46 = vpack.c.bf16 %v5634_v4, %v5634_v4 }
 0x589   :  { %v3572_v35 = vmax.f32 %v4884_v9, %v3568_v38  ;;  %v3641_v63 = vpack.c.bf16 %v3569_v13, %v3569_v13 }
 0x58a   :  { %v3642_v52 = vpack.c.bf16 %v3570_v15, %v3570_v15  ;;  %v3643_v23 = vpack.c.bf16 %v3571_v14, %v3571_v14 }
 0x58b   :  { %v3644_v19 = vpack.c.bf16 %v3572_v35, %v3572_v35 }
 0x58c   :  { %3933 = vmatprep.mubr.bf16.mxu1 %v3642_v52 }
 0x58d   :  { %3973 = vmatprep.mubr.bf16.mxu0 %v3644_v19  ;;  %3934 = vmatmul.mubr.bf16.vlgmr.msra.gmra.mrb[16].mxu1 %v3641_v63  ;;  %v164_v19 = vld [vmem:[#allocation16 + $0x7] ss:$0 sm:$0xff] }
 0x58e   :  { %3974 = vmatmul.mubr.bf16.vlgmr.msra.gmra.mrb[20].mxu0 %v3643_v23  ;;  %4822 = vmatpush3.bf16.msra.mxu1 %v5587_v61 }
 0x58f   :  { %4844 = vmatpush3.bf16.msra.mxu0 %v5588_v20  ;;  %4205 = vmatprep.mubr.bf16.mxu1 %v3574_v25 }
 0x590   :  { %4245 = vmatprep.mubr.bf16.mxu0 %v3576_v27  ;;  %4823 = vmatprep.subr.bf16.mxu1 %v5589_v24 }
 0x591   :  { %4845 = vmatprep.subr.bf16.mxu0 %v5590_v26 }
 0x592   :  { %4824 = vmatpush3.bf16.msra.mxu1 %v5591_v28 }
 0x593   :  { %4846 = vmatpush3.bf16.msra.mxu0 %v5592_v31  ;;  %4825 = vmatprep.subr.bf16.mxu1 %v5593_v32  ;;  %v4255_v32 = vand.u32 127, %v607_v21 }
 0x594   :  { %4847 = vmatprep.subr.bf16.mxu0 %v5594_v33 }
 0x595   :  { %vm4258_vm3 = vcmp.lt.s32.totalorder %v4255_v32, 6  ;;  %vm4256_vm4 = vcmp.lt.s32.totalorder %v4255_v32, 2 }
 0x596   :  { %4826 = vmatpush3.bf16.msra.mxu1 %v5595_v34 }
 0x597   :  { %4848 = vmatpush3.bf16.msra.mxu0 %v5596_v36  ;;  %4827 = vmatprep.subr.bf16.mxu1 %v5597_v37 }
 0x598   :  { %4849 = vmatprep.subr.bf16.mxu0 %v5598_v41 }
 0x59a   :  { %4828 = vmatpush3.bf16.msra.mxu1 %v5599_v48 }
 0x59b   :  { %4850 = vmatpush3.bf16.msra.mxu0 %v5600_v51  ;;  %4829 = vmatprep.subr.bf16.mxu1 %v5601_v53 }
 0x59c   :  { %4851 = vmatprep.subr.bf16.mxu0 %v5602_v54 }
 0x59e   :  { %4830 = vmatpush3.bf16.msra.mxu1 %v5603_v17 }
 0x59f   :  { %4852 = vmatpush3.bf16.msra.mxu0 %v5604_v39  ;;  %4831 = vmatprep.subr.bf16.mxu1 %v5605_v58 }
 0x5a0   :  { %4853 = vmatprep.subr.bf16.mxu0 %v5606_v59 }
 0x5a2   :  { %4832 = vmatpush3.bf16.msra.mxu1 %v5607_v40 }
 0x5a3   :  { %4854 = vmatpush3.bf16.msra.mxu0 %v5608_v57  ;;  %4833 = vmatprep.subr.bf16.mxu1 %v5609_v22 }
 0x5a4   :  { %4855 = vmatprep.subr.bf16.mxu0 %v5610_v29 }
 0x5a6   :  { %4834 = vmatpush3.bf16.msra.mxu1 %v5611_v60 }
 0x5a7   :  { %4856 = vmatpush3.bf16.msra.mxu0 %v5612_v30  ;;  %4835 = vmatprep.subr.bf16.mxu1 %v5613_v62 }
 0x5a8   :  { %4857 = vmatprep.subr.bf16.mxu0 %v5614_v0 }
 0x5aa   :  { %4836 = vmatpush3.bf16.msra.mxu1 %v5615_v1 }
 0x5ab   :  { %4858 = vmatpush3.bf16.msra.mxu0 %v5616_v2 }
 0x5ad   :  { %4206 = vmatmul.mubr.bf16.vlgmr.msra.gmra.mrb[20].mxu1 %v3573_v5 }
 0x5ae   :  { %4246 = vmatmul.mubr.bf16.vlgmr.msra.gmra.mrb[24].mxu0 %v3575_v46 }
 0x660   :  { %v4793_v6 = vpop.f32.mrb[16].mxu1 }
 0x661   :  { %v4815_v43 = vpop.f32.mrb[20].mxu0  ;;  %v4794_v45 = vpop.f32.mrb[17].mxu1 }
 0x662   :  { %v4795_v44 = vadd.f32 %v4794_v45, %v4793_v6  ;;  %v4816_v7 = vpop.f32.mrb[21].mxu0  ;;  %v4796_v8 = vpop.f32.mrb[18].mxu1 }
 0x663   :  { %v4817_v9 = vadd.f32 %v4816_v7, %v4815_v43  ;;  %v4818_v42 = vpop.f32.mrb[22].mxu0  ;;  %v4797_v10 = vpop.f32.mrb[19].mxu1 }
 0x664   :  { %v4819_v11 = vpop.f32.mrb[23].mxu0 }
 0x665   :  { %v3976_v12 = vadd.f32 %v4817_v9, %v4795_v44 }
 0x680   :  { %v4837_v49 = vpop.f32.mrb[20].mxu1 }
 0x681   :  { %v4859_v13 = vpop.f32.mrb[24].mxu0  ;;  %v4838_v38 = vpop.f32.mrb[21].mxu1 }
 0x682   :  { %v4839_v14 = vadd.f32 %v4838_v38, %v4837_v49  ;;  %v4860_v15 = vpop.f32.mrb[25].mxu0  ;;  %v4840_v35 = vpop.f32.mrb[22].mxu1 }
 0x683   :  { %v4861_v16 = vadd.f32 %v4860_v15, %v4859_v13  ;;  %v4862_v52 = vpop.f32.mrb[26].mxu0  ;;  %v4841_v61 = vpop.f32.mrb[23].mxu1 }
 0x684   :  { %v4208_v18 = vadd.f32 %v4839_v14, %v3976_v12  ;;  %v4863_v63 = vpop.f32.mrb[27].mxu0 }
 0x686   :  { %v4248_v20 = vadd.f32 %v4861_v16, %v4208_v18 }
 0x688   :  { %v4253_v23 = vadd.f32 %v4248_v20, %v164_v19 }
 0x68a   :  { %v4260_v24 = vand.u32 2147483647, %v4253_v23  ;;  %v4259_v33 = vmax.f32 %v4253_v23, 0.0 }
 0x68c   :  { %v4261_v25 = vsub.f32 0.0, %v4260_v24 }
 0x68e   :  { %v4262_v26 = vmul.f32 1.442695, %v4261_v25 }
 0x690   :  { %5635 = vpow2.f32 %v4262_v26 }
 0x69a   :  { %v5636_v27 = vpop.eup %5635 }
 0x69b   :  { %v4264_v28 = vadd.f32 1.0, %v5636_v27 }
 0x69d   :  { %5637 = vlog2.f32 %v4264_v28 }
 0x69e   :  { %5639 = vtanh.f32 %v4253_v23 }
 0x6a7   :  { %v5638_v31 = vpop.eup %5637 }
 0x6a8   :  { %v4266_v34 = vmul.f32 0.6931472, %v5638_v31  ;;  %v5640_v41 = vpop.eup %5639 }
 0x6aa   :  { %v4267_v36 = vadd.f32 %v4266_v34, %v4259_v33 }
 0x6ac   :  { %v4268_v37 = vadd.f32 1.0, %v4267_v36 }
 0x6ae   :  { %v4269_v47 = vsel %vm4258_vm3, %v4268_v37, %v4253_v23 }
 0x6af   :  { %v4270_v48 = vsel %vm4256_vm4, %v5640_v41, %v4269_v47 }
 0x6b0   :  { %4271 = vst [vmem:[#allocation17] sm:$0xff] %v4270_v48 }
 0x6b1   :  { %5850 = shalt.err (!%p5847_p6)
}
 0x6b2   :  { %s5851_s13 = scalar_lea.hbm %s6190_s9, 128 }
 0x6b3   :  { %p5852_p7 = scmp.ne.s32.totalorder %s6190_s9, %s5851_s13  ;;  %p5855_p8 = scmp.lt.u32.totalorder %s5851_s13, %s6190_s9 }
 0x6b5   :  { %p5857_p9 = pnand %p5855_p8, %p5852_p7 }
 0x6b7   :  { %5860 = shalt.err (!%p5857_p9)
}
 0x6b8   :  { %4281 = dma.vmem_to_hbm [thread:$0]  %s4279_s20, 128, %s6190_s9, [#allocation4]  }
 0x6b9   :  { %5871 = dma.done.wait [#allocation4], 128  }
 0x6ba   :  { %5872 = vsyncadd [#allocation4], 4294967168 }
 0x6bb   :  { %4285 = vsyncpa [#allocation3], 1 }
 0x6bc   :  { %4286 = vsyncpa [#allocation6], 1 }
 0x6bd   :  { %4287 = vsyncpa [#allocation9], 1 }
 0x6be   :  { %4288 = vsyncpa [#allocation12], 1 }
 0x6bf   :  { %4289 = vsyncpa [#allocation15], 1 }
 0x6c0   :  { %4290 = vsyncpa [#allocation4], 1 }

</bundles_post_ra>
